<compile_context>
chip_gen: v5e
topology: v5e:2x2
jax: 0.10.0
libtpu: 0.0.40
codegen_flags: <defaults>
</compile_context>

<pallas_src>
import functools

import jax
import jax.numpy as jnp
from jax.experimental import pallas as pl
from jax.experimental.pallas import tpu as pltpu

NEG_SLOPE = 0.01  # nn.LeakyReLU default


def _leaky(v):
    # max(v, 0.01*v): one mul + one max (vs compare + select).
    return jnp.maximum(v, v * NEG_SLOPE)


def _sa_residual_kernel(x_ref, w1_ref, b1_ref, w2_ref, b2_ref, o_ref, *, H):
    # x_ref / o_ref : (Mb, WC) f32, Mb = batch_block*H rows of packed (W*C)
    #                 pixels.  Lane axis = W*C (multiple of 128).
    # w*_ref        : (3, WC, WC) bf16 banded conv weights, one matrix per dh
    #                 tap; each folds all three dw taps + the W zero padding.
    # b*_ref        : (1, WC) f32 bias tiled over W.
    Mb, WC = x_ref.shape
    x = x_ref[...]

    # Border masks for the dh = -1 / +1 taps.  Row r of the flat block is
    # image r // H at height r % H; zeroing the border rows implements the H
    # zero padding AND stops adjacent images in the batch fold from mixing.
    row = jax.lax.broadcasted_iota(jnp.int32, (Mb, 1), 0)
    hpos = row % H
    not_top = hpos != 0        # row h-1 exists inside the same image
    not_bot = hpos != H - 1    # row h+1 exists inside the same image

    def shift_up(a):           # out[r] = a[r-1], zero at image-top rows
        sh = jnp.concatenate([jnp.zeros((1, WC), a.dtype), a[:-1, :]], axis=0)
        return jnp.where(not_top, sh, 0.0)

    def shift_dn(a):           # out[r] = a[r+1], zero at image-bottom rows
        sh = jnp.concatenate([a[1:, :], jnp.zeros((1, WC), a.dtype)], axis=0)
        return jnp.where(not_bot, sh, 0.0)

    def conv3x3(a, w_ref, b_ref):
        # One banded GEMM per dh tap: K = N = W*C, bf16 operands, f32 acc.
        up = shift_up(a).astype(jnp.bfloat16)
        mid = a.astype(jnp.bfloat16)
        dn = shift_dn(a).astype(jnp.bfloat16)
        acc = jnp.dot(up, w_ref[0], preferred_element_type=jnp.float32)
        acc = acc + jnp.dot(mid, w_ref[1], preferred_element_type=jnp.float32)
        acc = acc + jnp.dot(dn, w_ref[2], preferred_element_type=jnp.float32)
        return acc + b_ref[...]            # (Mb, WC) + (1, WC), f32

    a = _leaky(x)
    z = _leaky(conv3x3(a, w1_ref, b1_ref))
    y2 = conv3x3(z, w2_ref, b2_ref)

    # Residual add in f32; lane-dense (trailing dim = W*C) unmasked store.
    o_ref[...] = (x + y2).astype(o_ref.dtype)


def _banded_weights(w_hwio, W):
    """(3, 3, C, C) HWIO -> (3, W*C, W*C) banded matrices (f32).

    banded[dh][u*C + ci, w*C + co] = w_hwio[dh, u - w + 1, ci, co] when the dw
    tap (u - w + 1) is in {0, 1, 2}, else 0.  Multiplying a lane-packed row
    (W*C,) by banded[dh] applies the three dw taps of the 3x3 conv, including
    the zero padding along W (out-of-range taps simply contribute nothing).
    """
    C = w_hwio.shape[-1]
    mats = []
    for dh in range(3):
        m = jnp.zeros((W * C, W * C), w_hwio.dtype)
        for dw in range(3):
            m = m + jnp.kron(jnp.eye(W, k=1 - dw, dtype=w_hwio.dtype),
                             w_hwio[dh, dw])
        mats.append(m)
    return jnp.stack(mats)


def _tensorcores_per_chip():
    """Best-effort TensorCore count behind one JAX device (heuristic)."""
    try:
        kind = jax.devices()[0].device_kind.lower()
    except Exception:
        return 1
    # v7x (and the v4 / v5p megacore parts) expose 2 TensorCores behind one
    # device; v5e / v6e have a single TensorCore per chip.
    return 2 if ("7" in kind or "v4" in kind or "v5p" in kind) else 1


def _default_batch_block(B):
    cores = _tensorcores_per_chip()
    if cores > 1 and B % cores == 0:
        return B // cores   # one grid step per TensorCore ("parallel" grid)
    return B                # single step: biggest GEMM M, no per-step overhead


def sa_residual(x_nhwc, w1_hwio, b1, w2_hwio, b2, *, batch_block=None):
    """x_nhwc: (B, H, W, C) float32.  Returns (B, H, W, C) float32."""
    B, H, W, C = x_nhwc.shape
    WC = W * C
    if batch_block is None:
        batch_block = _default_batch_block(B)
    assert B % batch_block == 0, "batch must be divisible by batch_block"
    Mb = batch_block * H
    assert Mb % 8 == 0 and WC % 128 == 0, "block must be (8,128) aligned"

    # Free layout change: W and C packed together -> lane axis W*C; batch and
    # H flattened in the wrapper so the kernel block is a single 2-D slab.
    x2d = x_nhwc.reshape(B * H, WC)

    # Banded weights fold the 3 dw taps + W zero padding into one (WC, WC)
    # matrix per dh tap; bf16 operands for the native MXU path (accumulation
    # stays f32 in the kernel).
    bw1 = _banded_weights(w1_hwio, W).astype(jnp.bfloat16)
    bw2 = _banded_weights(w2_hwio, W).astype(jnp.bfloat16)
    b1t = jnp.tile(b1, W).reshape(1, WC).astype(jnp.float32)
    b2t = jnp.tile(b2, W).reshape(1, WC).astype(jnp.float32)

    grid = (B // batch_block,)

    # FLOPs the kernel actually issues: 6 banded GEMMs of (Mb, WC) x (WC, WC)
    # per grid step (~W/3x the true conv MAC count, by construction).
    flops = 2 * 6 * (B * H) * WC * WC
    bytes_accessed = (2 * B * H * WC * 4      # x in + out, f32
                      + 2 * 3 * WC * WC * 2   # banded weights, bf16, once
                      + 2 * WC * 4)           # biases

    # Explicit VMEM budget: double-buffered activation blocks + (worst case
    # double-buffered) bf16 weights + biases, with generous headroom.
    resident = (2 * (2 * Mb * WC * 4)
                + 2 * (2 * 3 * WC * WC * 2)
                + 2 * (2 * WC * 4))
    vmem_limit = int(max(16 * 2**20, min(48 * 2**20, 4 * resident)))

    out2d = pl.pallas_call(
        functools.partial(_sa_residual_kernel, H=H),
        out_shape=jax.ShapeDtypeStruct((B * H, WC), x_nhwc.dtype),
        grid=grid,
        in_specs=[
            pl.BlockSpec((Mb, WC), lambda i: (i, 0)),
            pl.BlockSpec((3, WC, WC), lambda i: (0, 0, 0)),
            pl.BlockSpec((1, WC), lambda i: (0, 0)),
            pl.BlockSpec((3, WC, WC), lambda i: (0, 0, 0)),
            pl.BlockSpec((1, WC), lambda i: (0, 0)),
        ],
        out_specs=pl.BlockSpec((Mb, WC), lambda i: (i, 0)),
        compiler_params=pltpu.CompilerParams(
            dimension_semantics=("parallel",),
            vmem_limit_bytes=vmem_limit),
        cost_estimate=pl.CostEstimate(
            flops=flops, transcendentals=0, bytes_accessed=bytes_accessed),
    )(x2d, bw1, b1t, bw2, b2t)

    return out2d.reshape(B, H, W, C)


def ref_forward(x_nhwc, w1_hwio, b1, w2_hwio, b2):
    """Pure-JAX f32 reference (PyTorch SAResidual semantics in NHWC)."""
    def conv(a, w, b):
        y = jax.lax.conv_general_dilated(
            a, w, window_strides=(1, 1), padding="SAME",
            dimension_numbers=("NHWC", "HWIO", "NHWC"))
        return y + b.reshape(1, 1, 1, -1)
    a = _leaky(x_nhwc)
    z = _leaky(conv(a, w1_hwio, b1))
    return x_nhwc + conv(z, w2_hwio, b2)


def ref_forward_bf16_operands(x_nhwc, w1_hwio, b1, w2_hwio, b2):
    """Same chain with conv operands rounded to bf16 — matches the kernel's
    MXU numerics (bf16 operands, f32 accumulate, f32 bias/act/residual)."""
    r = lambda t: t.astype(jnp.bfloat16).astype(jnp.float32)
    def conv(a, w, b):
        y = jax.lax.conv_general_dilated(
            r(a), r(w), window_strides=(1, 1), padding="SAME",
            dimension_numbers=("NHWC", "HWIO", "NHWC"))
        return y + b.reshape(1, 1, 1, -1)
    a = _leaky(x_nhwc)
    z = _leaky(conv(a, w1_hwio, b1))
    return x_nhwc + conv(z, w2_hwio, b2)


if __name__ == "__main__":
    depth = 16          # ScalableArch stage-1 SAResidual depth (model_scale=1)
    B, C, H, W = 2, depth, 16, 16

    key = jax.random.PRNGKey(0)
    kx, k1, kb1, k2, kb2 = jax.random.split(key, 5)

    # Input in PyTorch NCHW convention, moved to NHWC for the kernel.
    x_nchw = jax.random.normal(kx, (B, C, H, W), dtype=jnp.float32)
    x_nhwc = jnp.transpose(x_nchw, (0, 2, 3, 1))

    # Conv params generated in PyTorch OIHW layout, converted to HWIO.
    w1_oihw = 0.1 * jax.random.normal(k1, (C, C, 3, 3), dtype=jnp.float32)
    b1 = 0.1 * jax.random.normal(kb1, (C,), dtype=jnp.float32)
    w2_oihw = 0.1 * jax.random.normal(k2, (C, C, 3, 3), dtype=jnp.float32)
    b2 = 0.1 * jax.random.normal(kb2, (C,), dtype=jnp.float32)
    w1_hwio = jnp.transpose(w1_oihw, (2, 3, 1, 0))
    w2_hwio = jnp.transpose(w2_oihw, (2, 3, 1, 0))

    run = jax.jit(sa_residual, static_argnames=("batch_block",))
    out = jax.block_until_ready(run(x_nhwc, w1_hwio, b1, w2_hwio, b2))
    assert out.shape == (B, H, W, C)

    # Structural check: same bf16-operand conv numerics as the kernel, so
    # remaining differences are only MXU-vs-XLA accumulation order.
    ref_q = ref_forward_bf16_operands(x_nhwc, w1_hwio, b1, w2_hwio, b2)
    err_q = float(jnp.max(jnp.abs(out - ref_q)))
    assert jnp.allclose(out, ref_q, rtol=5e-3, atol=1e-2), err_q

    # End-to-end check against the full-f32 reference; tolerance accounts for
    # the bf16 MXU operands (weights 0.1*N(0,1), activations ~N(0,1)).
    ref = ref_forward(x_nhwc, w1_hwio, b1, w2_hwio, b2)
    err = float(jnp.max(jnp.abs(out - ref)))
    assert jnp.allclose(out, ref, rtol=2e-2, atol=8e-2), err

    print("KERNEL_OK")
</pallas_src>

<mosaic_0001>
module attributes {stable_mosaic.version = 11 : i64} {
  func.func @_sa_residual_kernel(%arg0: i32, %arg1: memref<32x256xf32, #tpu.memory_space<vmem>>, %arg2: memref<3x256x256xbf16, #tpu.memory_space<vmem>>, %arg3: memref<1x256xf32, #tpu.memory_space<vmem>>, %arg4: memref<3x256x256xbf16, #tpu.memory_space<vmem>>, %arg5: memref<1x256xf32, #tpu.memory_space<vmem>>, %arg6: memref<32x256xf32, #tpu.memory_space<vmem>>) attributes {dimension_semantics = [#tpu.dimension_semantics<parallel>], iteration_bounds = array<i64: 1>, scalar_prefetch = 0 : i64, scratch_operands = 0 : i64, tpu.core_type = #tpu.core_type<tc>, window_params = [{transform_indices = @transform_0, window_bounds = array<i64: 32, 256>}, {pipeline_mode = #tpu.pipeline_mode<synchronous>, transform_indices = @transform_1, window_bounds = array<i64: 3, 256, 256>}, {pipeline_mode = #tpu.pipeline_mode<synchronous>, transform_indices = @transform_2, window_bounds = array<i64: 1, 256>}, {pipeline_mode = #tpu.pipeline_mode<synchronous>, transform_indices = @transform_3, window_bounds = array<i64: 3, 256, 256>}, {pipeline_mode = #tpu.pipeline_mode<synchronous>, transform_indices = @transform_4, window_bounds = array<i64: 1, 256>}, {transform_indices = @transform_5, window_bounds = array<i64: 32, 256>}]} {
    %c0 = arith.constant 0 : index
    %c0_0 = arith.constant 0 : index
    %0 = vector.load %arg1[%c0, %c0_0] : memref<32x256xf32, #tpu.memory_space<vmem>>, vector<32x256xf32>
    %1 = tpu.iota {dimensions = array<i32: 0>} : vector<32x1xi32>
    %c16_i32 = arith.constant 16 : i32
    %c0_i32 = arith.constant 0 : i32
    %2 = arith.cmpi eq, %c16_i32, %c0_i32 : i32
    %c1_i32 = arith.constant 1 : i32
    %3 = arith.select %2, %c1_i32, %c16_i32 : i32
    %4 = vector.broadcast %3 : i32 to vector<32x1xi32>
    %5 = arith.remsi %1, %4 : vector<32x1xi32>
    %c0_i32_1 = arith.constant 0 : i32
    %6 = vector.broadcast %c0_i32_1 : i32 to vector<32x1xi32>
    %7 = arith.cmpi ne, %5, %6 : vector<32x1xi32>
    %c0_i32_2 = arith.constant 0 : i32
    %8 = vector.broadcast %c0_i32_2 : i32 to vector<32x1xi32>
    %9 = arith.cmpi slt, %5, %8 : vector<32x1xi32>
    %c0_i32_3 = arith.constant 0 : i32
    %10 = arith.cmpi slt, %3, %c0_i32_3 : i32
    %11 = vector.broadcast %10 : i1 to vector<32x1xi1>
    %12 = vector.broadcast %11 : vector<32x1xi1> to vector<32x1xi1>
    %13 = arith.xori %9, %12 : vector<32x1xi1>
    %14 = arith.andi %13, %7 : vector<32x1xi1>
    %15 = vector.broadcast %3 : i32 to vector<32x1xi32>
    %16 = arith.addi %5, %15 : vector<32x1xi32>
    %17 = arith.select %14, %16, %5 : vector<32x1xi1>, vector<32x1xi32>
    %c0_i32_4 = arith.constant 0 : i32
    %18 = vector.broadcast %c0_i32_4 : i32 to vector<32x1xi32>
    %19 = arith.cmpi ne, %17, %18 : vector<32x1xi32>
    %c15_i32 = arith.constant 15 : i32
    %20 = vector.broadcast %c15_i32 : i32 to vector<32x1xi32>
    %21 = arith.cmpi ne, %17, %20 : vector<32x1xi32>
    %cst = arith.constant 0.00999999977 : f32
    %22 = vector.broadcast %cst : f32 to vector<32x256xf32>
    %23 = arith.mulf %0, %22 : vector<32x256xf32>
    %24 = arith.maximumf %0, %23 : vector<32x256xf32>
    %cst_5 = arith.constant 0.000000e+00 : f32
    %25 = vector.broadcast %cst_5 : f32 to vector<1x256xf32>
    %26 = vector.extract_strided_slice %24 {offsets = [0, 0], sizes = [31, 256], strides = [1, 1]} : vector<32x256xf32> to vector<31x256xf32>
    %27 = tpu.concatenate %25, %26 in 0 : vector<1x256xf32>, vector<31x256xf32> -> vector<32x256xf32>
    %cst_6 = arith.constant 0.000000e+00 : f32
    %28 = vector.shape_cast %19 : vector<32x1xi1> to vector<32x1xi1>
    %29 = vector.broadcast %28 : vector<32x1xi1> to vector<32x256xi1>
    %30 = vector.broadcast %cst_6 : f32 to vector<32x256xf32>
    %31 = arith.select %29, %27, %30 : vector<32x256xi1>, vector<32x256xf32>
    %32 = arith.truncf %31 : vector<32x256xf32> to vector<32x256xbf16>
    %33 = arith.truncf %24 : vector<32x256xf32> to vector<32x256xbf16>
    %34 = vector.extract_strided_slice %24 {offsets = [1, 0], sizes = [31, 256], strides = [1, 1]} : vector<32x256xf32> to vector<31x256xf32>
    %cst_7 = arith.constant 0.000000e+00 : f32
    %35 = vector.broadcast %cst_7 : f32 to vector<1x256xf32>
    %36 = tpu.concatenate %34, %35 in 0 : vector<31x256xf32>, vector<1x256xf32> -> vector<32x256xf32>
    %cst_8 = arith.constant 0.000000e+00 : f32
    %37 = vector.shape_cast %21 : vector<32x1xi1> to vector<32x1xi1>
    %38 = vector.broadcast %37 : vector<32x1xi1> to vector<32x256xi1>
    %39 = vector.broadcast %cst_8 : f32 to vector<32x256xf32>
    %40 = arith.select %38, %36, %39 : vector<32x256xi1>, vector<32x256xf32>
    %41 = arith.truncf %40 : vector<32x256xf32> to vector<32x256xbf16>
    %c0_9 = arith.constant 0 : index
    %c0_10 = arith.constant 0 : index
    %c0_11 = arith.constant 0 : index
    %42 = vector.load %arg2[%c0_9, %c0_10, %c0_11] : memref<3x256x256xbf16, #tpu.memory_space<vmem>>, vector<1x256x256xbf16>
    %43 = vector.shape_cast %42 : vector<1x256x256xbf16> to vector<256x256xbf16>
    %cst_12 = arith.constant dense<0.000000e+00> : vector<32x256xf32>
    %44 = tpu.matmul %32, %43, %cst_12 {dimension_numbers = #tpu.dot_dimension_numbers<[1], [0], [0], [1], [0, 0, 1, 1], [], []>} : vector<32x256xbf16>, vector<256x256xbf16>, vector<32x256xf32> -> vector<32x256xf32>
    %c1 = arith.constant 1 : index
    %c0_13 = arith.constant 0 : index
    %c0_14 = arith.constant 0 : index
    %45 = vector.load %arg2[%c1, %c0_13, %c0_14] : memref<3x256x256xbf16, #tpu.memory_space<vmem>>, vector<1x256x256xbf16>
    %46 = vector.shape_cast %45 : vector<1x256x256xbf16> to vector<256x256xbf16>
    %cst_15 = arith.constant dense<0.000000e+00> : vector<32x256xf32>
    %47 = tpu.matmul %33, %46, %cst_15 {dimension_numbers = #tpu.dot_dimension_numbers<[1], [0], [0], [1], [0, 0, 1, 1], [], []>} : vector<32x256xbf16>, vector<256x256xbf16>, vector<32x256xf32> -> vector<32x256xf32>
    %48 = arith.addf %44, %47 : vector<32x256xf32>
    %c2 = arith.constant 2 : index
    %c0_16 = arith.constant 0 : index
    %c0_17 = arith.constant 0 : index
    %49 = vector.load %arg2[%c2, %c0_16, %c0_17] : memref<3x256x256xbf16, #tpu.memory_space<vmem>>, vector<1x256x256xbf16>
    %50 = vector.shape_cast %49 : vector<1x256x256xbf16> to vector<256x256xbf16>
    %cst_18 = arith.constant dense<0.000000e+00> : vector<32x256xf32>
    %51 = tpu.matmul %41, %50, %cst_18 {dimension_numbers = #tpu.dot_dimension_numbers<[1], [0], [0], [1], [0, 0, 1, 1], [], []>} : vector<32x256xbf16>, vector<256x256xbf16>, vector<32x256xf32> -> vector<32x256xf32>
    %52 = arith.addf %48, %51 : vector<32x256xf32>
    %c0_19 = arith.constant 0 : index
    %c0_20 = arith.constant 0 : index
    %53 = vector.load %arg3[%c0_19, %c0_20] : memref<1x256xf32, #tpu.memory_space<vmem>>, vector<1x256xf32>
    %54 = vector.broadcast %53 : vector<1x256xf32> to vector<32x256xf32>
    %55 = arith.addf %52, %54 : vector<32x256xf32>
    %cst_21 = arith.constant 0.00999999977 : f32
    %56 = vector.broadcast %cst_21 : f32 to vector<32x256xf32>
    %57 = arith.mulf %55, %56 : vector<32x256xf32>
    %58 = arith.maximumf %55, %57 : vector<32x256xf32>
    %cst_22 = arith.constant 0.000000e+00 : f32
    %59 = vector.broadcast %cst_22 : f32 to vector<1x256xf32>
    %60 = vector.extract_strided_slice %58 {offsets = [0, 0], sizes = [31, 256], strides = [1, 1]} : vector<32x256xf32> to vector<31x256xf32>
    %61 = tpu.concatenate %59, %60 in 0 : vector<1x256xf32>, vector<31x256xf32> -> vector<32x256xf32>
    %cst_23 = arith.constant 0.000000e+00 : f32
    %62 = vector.shape_cast %19 : vector<32x1xi1> to vector<32x1xi1>
    %63 = vector.broadcast %62 : vector<32x1xi1> to vector<32x256xi1>
    %64 = vector.broadcast %cst_23 : f32 to vector<32x256xf32>
    %65 = arith.select %63, %61, %64 : vector<32x256xi1>, vector<32x256xf32>
    %66 = arith.truncf %65 : vector<32x256xf32> to vector<32x256xbf16>
    %67 = arith.truncf %58 : vector<32x256xf32> to vector<32x256xbf16>
    %68 = vector.extract_strided_slice %58 {offsets = [1, 0], sizes = [31, 256], strides = [1, 1]} : vector<32x256xf32> to vector<31x256xf32>
    %cst_24 = arith.constant 0.000000e+00 : f32
    %69 = vector.broadcast %cst_24 : f32 to vector<1x256xf32>
    %70 = tpu.concatenate %68, %69 in 0 : vector<31x256xf32>, vector<1x256xf32> -> vector<32x256xf32>
    %cst_25 = arith.constant 0.000000e+00 : f32
    %71 = vector.shape_cast %21 : vector<32x1xi1> to vector<32x1xi1>
    %72 = vector.broadcast %71 : vector<32x1xi1> to vector<32x256xi1>
    %73 = vector.broadcast %cst_25 : f32 to vector<32x256xf32>
    %74 = arith.select %72, %70, %73 : vector<32x256xi1>, vector<32x256xf32>
    %75 = arith.truncf %74 : vector<32x256xf32> to vector<32x256xbf16>
    %c0_26 = arith.constant 0 : index
    %c0_27 = arith.constant 0 : index
    %c0_28 = arith.constant 0 : index
    %76 = vector.load %arg4[%c0_26, %c0_27, %c0_28] : memref<3x256x256xbf16, #tpu.memory_space<vmem>>, vector<1x256x256xbf16>
    %77 = vector.shape_cast %76 : vector<1x256x256xbf16> to vector<256x256xbf16>
    %cst_29 = arith.constant dense<0.000000e+00> : vector<32x256xf32>
    %78 = tpu.matmul %66, %77, %cst_29 {dimension_numbers = #tpu.dot_dimension_numbers<[1], [0], [0], [1], [0, 0, 1, 1], [], []>} : vector<32x256xbf16>, vector<256x256xbf16>, vector<32x256xf32> -> vector<32x256xf32>
    %c1_30 = arith.constant 1 : index
    %c0_31 = arith.constant 0 : index
    %c0_32 = arith.constant 0 : index
    %79 = vector.load %arg4[%c1_30, %c0_31, %c0_32] : memref<3x256x256xbf16, #tpu.memory_space<vmem>>, vector<1x256x256xbf16>
    %80 = vector.shape_cast %79 : vector<1x256x256xbf16> to vector<256x256xbf16>
    %cst_33 = arith.constant dense<0.000000e+00> : vector<32x256xf32>
    %81 = tpu.matmul %67, %80, %cst_33 {dimension_numbers = #tpu.dot_dimension_numbers<[1], [0], [0], [1], [0, 0, 1, 1], [], []>} : vector<32x256xbf16>, vector<256x256xbf16>, vector<32x256xf32> -> vector<32x256xf32>
    %82 = arith.addf %78, %81 : vector<32x256xf32>
    %c2_34 = arith.constant 2 : index
    %c0_35 = arith.constant 0 : index
    %c0_36 = arith.constant 0 : index
    %83 = vector.load %arg4[%c2_34, %c0_35, %c0_36] : memref<3x256x256xbf16, #tpu.memory_space<vmem>>, vector<1x256x256xbf16>
    %84 = vector.shape_cast %83 : vector<1x256x256xbf16> to vector<256x256xbf16>
    %cst_37 = arith.constant dense<0.000000e+00> : vector<32x256xf32>
    %85 = tpu.matmul %75, %84, %cst_37 {dimension_numbers = #tpu.dot_dimension_numbers<[1], [0], [0], [1], [0, 0, 1, 1], [], []>} : vector<32x256xbf16>, vector<256x256xbf16>, vector<32x256xf32> -> vector<32x256xf32>
    %86 = arith.addf %82, %85 : vector<32x256xf32>
    %c0_38 = arith.constant 0 : index
    %c0_39 = arith.constant 0 : index
    %87 = vector.load %arg5[%c0_38, %c0_39] : memref<1x256xf32, #tpu.memory_space<vmem>>, vector<1x256xf32>
    %88 = vector.broadcast %87 : vector<1x256xf32> to vector<32x256xf32>
    %89 = arith.addf %86, %88 : vector<32x256xf32>
    %90 = arith.addf %0, %89 : vector<32x256xf32>
    %c0_40 = arith.constant 0 : index
    %c0_41 = arith.constant 0 : index
    %91 = vector.load %arg6[%c0_40, %c0_41] : memref<32x256xf32, #tpu.memory_space<vmem>>, vector<32x256xf32>
    tpu.vector_store %arg6[%c0_40, %c0_41], %90 {strides = array<i32>} : memref<32x256xf32, #tpu.memory_space<vmem>>, vector<32x256xf32>,
    return
  }
  func.func @transform_0(%arg0: i32) -> (i32, i32) {
    %c0_i32 = arith.constant 0 : i32
    %c0_i32_0 = arith.constant 0 : i32
    return %arg0, %c0_i32 : i32, i32
  }
  func.func @transform_1(%arg0: i32) -> (i32, i32, i32) {
    %c0_i32 = arith.constant 0 : i32
    %c0_i32_0 = arith.constant 0 : i32
    %c0_i32_1 = arith.constant 0 : i32
    %c0_i32_2 = arith.constant 0 : i32
    return %c0_i32, %c0_i32_0, %c0_i32_1 : i32, i32, i32
  }
  func.func @transform_2(%arg0: i32) -> (i32, i32) {
    %c0_i32 = arith.constant 0 : i32
    %c0_i32_0 = arith.constant 0 : i32
    %c0_i32_1 = arith.constant 0 : i32
    return %c0_i32, %c0_i32_0 : i32, i32
  }
  func.func @transform_3(%arg0: i32) -> (i32, i32, i32) {
    %c0_i32 = arith.constant 0 : i32
    %c0_i32_0 = arith.constant 0 : i32
    %c0_i32_1 = arith.constant 0 : i32
    %c0_i32_2 = arith.constant 0 : i32
    return %c0_i32, %c0_i32_0, %c0_i32_1 : i32, i32, i32
  }
  func.func @transform_4(%arg0: i32) -> (i32, i32) {
    %c0_i32 = arith.constant 0 : i32
    %c0_i32_0 = arith.constant 0 : i32
    %c0_i32_1 = arith.constant 0 : i32
    return %c0_i32, %c0_i32_0 : i32, i32
  }
  func.func @transform_5(%arg0: i32) -> (i32, i32) {
    %c0_i32 = arith.constant 0 : i32
    %c0_i32_0 = arith.constant 0 : i32
    return %arg0, %c0_i32 : i32, i32
  }
}

</mosaic_0001>

<bundles_post_ra>
// kernel: tile.13
= control target key start
LH: loop header
LB: loop body
LE: loop exit
PB: predicated region body
PF: predicated region fallthrough
CT: control target
= control target key end

     0   :  { %s28_s0 = inlined_call_operand.vmem [shape: f32[16], index: 0, kind: input, shape index: {}]   ;;  %s29_s1 = inlined_call_operand.vmem [shape: f32[16,16], index: 1, kind: output, shape index: {}]  }
   0x1   :  { %v4_v0 = vld [vmem:[%s28_s0] ss:$0 sm:$0xff] }
   0x2   :  { %5 = vst [vmem:[%s29_s1] sm:$0xff] %v4_v0 }
   0x3   :  { %8 = vst [vmem:[%s29_s1 + $0x8] sm:$0xff] %v4_v0 }

// kernel: tile.14
= control target key start
LH: loop header
LB: loop body
LE: loop exit
PB: predicated region body
PF: predicated region fallthrough
CT: control target
= control target key end

     0   :  { %s7_s6 = smov 3  ;;  %s21_s9 = smov 3  ;;  %vm4_vm0 = vcmask 130048   ;;  %vm11_vm1 = vcmask 1048448   ;;  %vm18_vm2 = vcmask 917248   ;;  %vm25_vm3 = vcmask 786048   ;;  %s129_s0 = inlined_call_operand.vmem [shape: f32[16,16], index: 0, kind: input, shape index: {}]   ;;  %s130_s1 = inlined_call_operand.vmem [shape: f32[1,256], index: 1, kind: output, shape index: {}]  }
   0x1   :  { %v67_v0 = vld [vmem:[%s129_s0 + $0x7] ss:$8 sm:%s7_s6]   ;;  %s82_s10 = smov 112   ;;  %v69_v1 = vld [vmem:[%s129_s0 + $0x5] ss:$8 sm:%s21_s9]   ;;  %s83_s13 = smov 80  }
   0x2   :  { %9 = vrot.lane.b32.xlu0 %v67_v0, %s82_s10  ;;  %23 = vrot.lane.b32.xlu1 %v69_v1, %s83_s13  ;;  %s14_s14 = smov 3  ;;  %s28_s15 = smov 3  ;;  %vm32_vm4 = vcmask 654848   ;;  %vm39_vm5 = vcmask 523648   ;;  %vm46_vm6 = vcmask 392448   ;;  %vm53_vm7 = vcmask 261248  }
   0x3   :  { %s35_s16 = smov 3  ;;  %v68_v3 = vld [vmem:[%s129_s0 + $0x6] ss:$8 sm:%s14_s14]   ;;  %s84_s21 = smov 48   ;;  %v70_v4 = vld [vmem:[%s129_s0 + $0x4] ss:$8 sm:%s28_s15]  }
   0x4   :  { %v71_v2 = vld [vmem:[%s129_s0 + $0x3] ss:$8 sm:%s35_s16]   ;;  %s42_s24 = smov 3  ;;  %s85_s25 = smov 96  }
   0x5   :  { %37 = vrot.lane.b32.xlu2 %v71_v2, %s84_s21  ;;  %s86_s26 = smov 64   ;;  %s49_s27 = smov 3  ;;  %v72_v5 = vld [vmem:[%s129_s0 + $0x2] ss:$8 sm:%s42_s24]  }
   0x6   :  { %v73_v6 = vld [vmem:[%s129_s0 + $0x1] ss:$8 sm:%s49_s27]   ;;  %s87_s3 = smov 32   ;;  %s88_s4 = smov 16  }
   0x7   :  { %s2_s5 = smov 3 }
   0x8   :  { %v3_v7 = vld [vmem:[%s129_s0] ss:$8 sm:%s2_s5]  }
   0x9   :  { %5 = vst.msk [vmem:[#allocation0] ss:$8 sm:$0x3] %vm4_vm0, %v3_v7  }
   0xa   :  { %16 = vrot.lane.b32.xlu0 %v68_v3, %s85_s25  ;;  %30 = vrot.lane.b32.xlu1 %v70_v4, %s86_s26 }
   0xd   :  { %44 = vrot.lane.b32.xlu2 %v72_v5, %s87_s3 }
  0x12   :  { %51 = vrot.lane.b32.xlu0 %v73_v6, %s88_s4 }
  0x5f   :  { %v38_v8 = vpop.permute.xlu2 %37  }
  0x67   :  { %v45_v9 = vpop.permute.xlu2 %44  }
  0x74   :  { %v10_v10 = vpop.permute.xlu0 %9   ;;  %v24_v11 = vpop.permute.xlu1 %23  }
  0x75   :  { %12 = vst.msk [vmem:[#allocation0] ss:$8 sm:$0x3] %vm11_vm1, %v10_v10  }
  0x7c   :  { %v17_v12 = vpop.permute.xlu0 %16   ;;  %v31_v13 = vpop.permute.xlu1 %30  }
  0x7d   :  { %19 = vst.msk [vmem:[#allocation0] ss:$8 sm:$0x3] %vm18_vm2, %v17_v12  }
  0x7e   :  { %26 = vst.msk [vmem:[#allocation0] ss:$8 sm:$0x3] %vm25_vm3, %v24_v11  }
  0x7f   :  { %33 = vst.msk [vmem:[#allocation0] ss:$8 sm:$0x3] %vm32_vm4, %v31_v13  }
  0x80   :  { %40 = vst.msk [vmem:[#allocation0] ss:$8 sm:$0x3] %vm39_vm5, %v38_v8  }
  0x81   :  { %47 = vst.msk [vmem:[#allocation0] ss:$8 sm:$0x3] %vm46_vm6, %v45_v9  }
  0x84   :  { %v52_v14 = vpop.permute.xlu0 %51  }
  0x85   :  { %54 = vst.msk [vmem:[#allocation0] ss:$8 sm:$0x3] %vm53_vm7, %v52_v14  }
  0x8c   :  { %v57_v15 = vld [vmem:[#allocation0] sm:$0x1]  ;;  %v62_v16 = vld [vmem:[#allocation0 + $0x8] sm:$0x1] }
  0x8d   :  { %60 = vst [vmem:[%s130_s1] sm:$0x1] %v57_v15 }
  0x8e   :  { %74 = vst [vmem:[%s130_s1 + $0x1] sm:$0x1] %v62_v16 }

// kernel: sa_residual.1
= control target key start
LH: loop header
LB: loop body
LE: loop exit
PB: predicated region body
PF: predicated region fallthrough
CT: control target
= control target key end

     0   :  { %vm113_vm0 = vcmask 1040384   ;;  %vm3176_vm2 = vmmov 1   ;;  %vm162_vm6 = vcmask 1046528   ;;  %s4829_s1 = inlined_call_operand.vmem [shape: bf16[3,256,256], index: 1, kind: input, shape index: {}]   ;;  %s4830_s0 = inlined_call_operand.vmem [shape: f32[32,256], index: 0, kind: input, shape index: {}]   ;;  %s4831_s3 = inlined_call_operand.vmem [shape: bf16[3,256,256], index: 3, kind: input, shape index: {}]   ;;  %s4832_s2 = inlined_call_operand.vmem [shape: f32[1,256], index: 2, kind: input, shape index: {}]   ;;  %s4833_s4 = inlined_call_operand.vmem [shape: f32[1,256], index: 4, kind: input, shape index: {}]   ;;  %s4834_s5 = inlined_call_operand.vmem [shape: f32[32,256], index: 5, kind: output, shape index: {}]  }
   0x1   :  { %v2073_v0 = vld [vmem:[%s4829_s1 + $0x170] sm:$0xf]  ;;  %v3022_v1 = vld [vmem:[%s4829_s1 + $0x174] sm:$0xf0]  ;;  %v3021_v5 = vld [vmem:[%s4829_s1 + $0x174] sm:$0xf] }
   0x2   :  { %v2137_v2 = vld [vmem:[%s4829_s1 + $0x1f0] sm:$0xf]  ;;  %v2074_v3 = vor.u32 %v3022_v1, %v2073_v0  ;;  %v3038_v4 = vld [vmem:[%s4829_s1 + $0x1f4] sm:$0xf0]  ;;  %v2075_v6 = vld [vmem:[%s4829_s1 + $0x178] sm:$0xf0] }
   0x3   :  { %v2138_v7 = vor.u32 %v3038_v4, %v2137_v2  ;;  %v2078_v8 = vor.u32 %v3021_v5, %v2075_v6  ;;  %v3037_v9 = vld [vmem:[%s4829_s1 + $0x1f4] sm:$0xf]  ;;  %v2139_v10 = vld [vmem:[%s4829_s1 + $0x1f8] sm:$0xf0]  ;;  %v2065_v11 = vld [vmem:[%s4829_s1 + $0x160] sm:$0xf] }
   0x4   :  { %432 = vmatpush.bf16.msra.mxu0 %v2074_v3  ;;  %v2142_v12 = vor.u32 %v3037_v9, %v2139_v10  ;;  %v3020_v13 = vld [vmem:[%s4829_s1 + $0x164] sm:$0xf0]  ;;  %v2129_v14 = vld [vmem:[%s4829_s1 + $0x1e0] sm:$0xf]  ;;  %v3019_v18 = vld [vmem:[%s4829_s1 + $0x164] sm:$0xf] }
   0x5   :  { %v3036_v15 = vld [vmem:[%s4829_s1 + $0x1e4] sm:$0xf0]  ;;  %451 = vmatpush.bf16.msra.mxu1 %v2138_v7  ;;  %470 = vmatpush.bf16.msra.mxu2 %v2078_v8  ;;  %v2066_v16 = vor.u32 %v3020_v13, %v2065_v11  ;;  %v2067_v19 = vld [vmem:[%s4829_s1 + $0x168] sm:$0xf0]  ;;  %v3035_v20 = vld [vmem:[%s4829_s1 + $0x1e4] sm:$0xf] }
   0x6   :  { %v2130_v17 = vor.u32 %v3036_v15, %v2129_v14  ;;  %489 = vmatpush.bf16.msra.mxu3 %v2142_v12  ;;  %v2070_v21 = vor.u32 %v3019_v18, %v2067_v19  ;;  %v2131_v22 = vld [vmem:[%s4829_s1 + $0x1e8] sm:$0xf0]  ;;  %v2057_v23 = vld [vmem:[%s4829_s1 + $0x150] sm:$0xf]  ;;  %v3018_v24 = vld [vmem:[%s4829_s1 + $0x154] sm:$0xf0] }
   0x7   :  { %v2134_v25 = vor.u32 %v3035_v20, %v2131_v22  ;;  %v2121_v26 = vld [vmem:[%s4829_s1 + $0x1d0] sm:$0xf]  ;;  %v3034_v27 = vld [vmem:[%s4829_s1 + $0x1d4] sm:$0xf0]  ;;  %v3017_v28 = vld [vmem:[%s4829_s1 + $0x154] sm:$0xf]  ;;  %v2058_v29 = vor.u32 %v3018_v24, %v2057_v23 }
   0x8   :  { %433 = vmatpush.bf16.msra.mxu0 %v2066_v16  ;;  %v2059_v30 = vld [vmem:[%s4829_s1 + $0x158] sm:$0xf0]  ;;  %v3033_v31 = vld [vmem:[%s4829_s1 + $0x1d4] sm:$0xf]  ;;  %v2122_v33 = vor.u32 %v3034_v27, %v2121_v26  ;;  %v2049_v35 = vld [vmem:[%s4829_s1 + $0x140] sm:$0xf] }
   0x9   :  { %v2123_v32 = vld [vmem:[%s4829_s1 + $0x1d8] sm:$0xf0]  ;;  %452 = vmatpush.bf16.msra.mxu1 %v2130_v17  ;;  %471 = vmatpush.bf16.msra.mxu2 %v2070_v21  ;;  %v2062_v34 = vor.u32 %v3017_v28, %v2059_v30  ;;  %v3016_v36 = vld [vmem:[%s4829_s1 + $0x144] sm:$0xf0]  ;;  %v2113_v37 = vld [vmem:[%s4829_s1 + $0x1c0] sm:$0xf] }
   0xa   :  { %490 = vmatpush.bf16.msra.mxu3 %v2134_v25  ;;  %v2126_v38 = vor.u32 %v3033_v31, %v2123_v32  ;;  %v3032_v39 = vld [vmem:[%s4829_s1 + $0x1c4] sm:$0xf0]  ;;  %v3015_v40 = vld [vmem:[%s4829_s1 + $0x144] sm:$0xf]  ;;  %v2051_v41 = vld [vmem:[%s4829_s1 + $0x148] sm:$0xf0]  ;;  %v2050_v44 = vor.u32 %v3016_v36, %v2049_v35 }
   0xb   :  { %v3031_v42 = vld [vmem:[%s4829_s1 + $0x1c4] sm:$0xf]  ;;  %v2115_v43 = vld [vmem:[%s4829_s1 + $0x1c8] sm:$0xf0]  ;;  %v2114_v45 = vor.u32 %v3032_v39, %v2113_v37  ;;  %v2054_v46 = vor.u32 %v3015_v40, %v2051_v41  ;;  %v2041_v47 = vld [vmem:[%s4829_s1 + $0x130] sm:$0xf] }
   0xc   :  { %434 = vmatpush.bf16.msra.mxu0 %v2058_v29  ;;  %v3014_v48 = vld [vmem:[%s4829_s1 + $0x134] sm:$0xf0]  ;;  %v2105_v49 = vld [vmem:[%s4829_s1 + $0x1b0] sm:$0xf]  ;;  %v2118_v50 = vor.u32 %v3031_v42, %v2115_v43  ;;  %v3013_v52 = vld [vmem:[%s4829_s1 + $0x134] sm:$0xf] }
   0xd   :  { %453 = vmatpush.bf16.msra.mxu1 %v2122_v33  ;;  %472 = vmatpush.bf16.msra.mxu2 %v2062_v34  ;;  %v3030_v51 = vld [vmem:[%s4829_s1 + $0x1b4] sm:$0xf0]  ;;  %v2043_v53 = vld [vmem:[%s4829_s1 + $0x138] sm:$0xf0]  ;;  %v3029_v54 = vld [vmem:[%s4829_s1 + $0x1b4] sm:$0xf]  ;;  %v2042_v56 = vor.u32 %v3014_v48, %v2041_v47 }
   0xe   :  { %491 = vmatpush.bf16.msra.mxu3 %v2126_v38  ;;  %v2107_v55 = vld [vmem:[%s4829_s1 + $0x1b8] sm:$0xf0]  ;;  %v2106_v57 = vor.u32 %v3030_v51, %v2105_v49  ;;  %v2046_v58 = vor.u32 %v3013_v52, %v2043_v53  ;;  %v2033_v59 = vld [vmem:[%s4829_s1 + $0x120] sm:$0xf]  ;;  %v3012_v60 = vld [vmem:[%s4829_s1 + $0x124] sm:$0xf0] }
   0xf   :  { %v2097_v61 = vld [vmem:[%s4829_s1 + $0x1a0] sm:$0xf]  ;;  %v2110_v62 = vor.u32 %v3029_v54, %v2107_v55  ;;  %v3028_v63 = vld [vmem:[%s4829_s1 + $0x1a4] sm:$0xf0]  ;;  %v3011_v0 = vld [vmem:[%s4829_s1 + $0x124] sm:$0xf]  ;;  %v2034_v5 = vor.u32 %v3012_v60, %v2033_v59 }
  0x10   :  { %435 = vmatpush.bf16.msra.mxu0 %v2050_v44  ;;  %v2035_v1 = vld [vmem:[%s4829_s1 + $0x128] sm:$0xf0]  ;;  %v3027_v2 = vld [vmem:[%s4829_s1 + $0x1a4] sm:$0xf]  ;;  %v2025_v4 = vld [vmem:[%s4829_s1 + $0x110] sm:$0xf]  ;;  %v2098_v9 = vor.u32 %v3028_v63, %v2097_v61 }
  0x11   :  { %454 = vmatpush.bf16.msra.mxu1 %v2114_v45  ;;  %473 = vmatpush.bf16.msra.mxu2 %v2054_v46  ;;  %v2099_v3 = vld [vmem:[%s4829_s1 + $0x1a8] sm:$0xf0]  ;;  %v3010_v6 = vld [vmem:[%s4829_s1 + $0x114] sm:$0xf0]  ;;  %v2089_v7 = vld [vmem:[%s4829_s1 + $0x190] sm:$0xf]  ;;  %v2038_v10 = vor.u32 %v3011_v0, %v2035_v1 }
  0x12   :  { %492 = vmatpush.bf16.msra.mxu3 %v2118_v50  ;;  %v3026_v8 = vld [vmem:[%s4829_s1 + $0x194] sm:$0xf0]  ;;  %v3009_v11 = vld [vmem:[%s4829_s1 + $0x114] sm:$0xf]  ;;  %v2027_v12 = vld [vmem:[%s4829_s1 + $0x118] sm:$0xf0]  ;;  %v2102_v14 = vor.u32 %v3027_v2, %v2099_v3  ;;  %v2026_v22 = vor.u32 %v3010_v6, %v2025_v4 }
  0x13   :  { %v3025_v13 = vld [vmem:[%s4829_s1 + $0x194] sm:$0xf]  ;;  %v2091_v15 = vld [vmem:[%s4829_s1 + $0x198] sm:$0xf0]  ;;  %v20_v16 = vld [vmem:[%s4830_s0] sm:$0xff]  ;;  %v2090_v26 = vor.u32 %v3026_v8, %v2089_v7  ;;  %v2030_v27 = vor.u32 %v3009_v11, %v2027_v12 }
  0x14   :  { %436 = vmatpush.bf16.msra.mxu0 %v2042_v56  ;;  %v22_v17 = vld [vmem:[%s4830_s0 + $0x10] sm:$0xff]  ;;  %v89_v18 = vmul.f32 0.01, %v20_v16  ;;  %v21_v20 = vld [vmem:[%s4830_s0 + $0x8] sm:$0xff]  ;;  %v23_v21 = vld [vmem:[%s4830_s0 + $0x18] sm:$0xff]  ;;  %v2094_v31 = vor.u32 %v3025_v13, %v2091_v15 }
  0x15   :  { %455 = vmatpush.bf16.msra.mxu1 %v2106_v57  ;;  %474 = vmatpush.bf16.msra.mxu2 %v2046_v58  ;;  %v91_v19 = vmul.f32 0.01, %v22_v17  ;;  %v2017_v23 = vld [vmem:[%s4829_s1 + $0x100] sm:$0xf]  ;;  %v90_v24 = vmul.f32 0.01, %v21_v20 }
  0x16   :  { %493 = vmatpush.bf16.msra.mxu3 %v2110_v62  ;;  %v92_v25 = vmul.f32 0.01, %v23_v21  ;;  %v3008_v28 = vld [vmem:[%s4829_s1 + $0x104] sm:$0xf0]  ;;  %v2081_v29 = vld [vmem:[%s4829_s1 + $0x180] sm:$0xf]  ;;  %v3411_v36 = vmax.f32 %v20_v16, %v89_v18 }
  0x17   :  { %v3024_v30 = vld [vmem:[%s4829_s1 + $0x184] sm:$0xf0]  ;;  %v3007_v32 = vld [vmem:[%s4829_s1 + $0x104] sm:$0xf]  ;;  %v2019_v33 = vld [vmem:[%s4829_s1 + $0x108] sm:$0xf0]  ;;  %v3413_v37 = vmax.f32 %v22_v17, %v91_v19  ;;  %v2018_v40 = vor.u32 %v3008_v28, %v2017_v23  ;;  %v3421_v41 = vmax.f32 %v21_v20, %v90_v24 }
  0x18   :  { %437 = vmatpush.bf16.msra.mxu0 %v2034_v5  ;;  %v3023_v34 = vld [vmem:[%s4829_s1 + $0x184] sm:$0xf]  ;;  %v2083_v35 = vld [vmem:[%s4829_s1 + $0x188] sm:$0xf0]  ;;  %v2989_v38 = vld [vmem:[%s4829_s1 + $0x74] sm:$0xf]  ;;  %v3423_v42 = vmax.f32 %v23_v21, %v92_v25  ;;  %v2082_v45 = vor.u32 %v3024_v30, %v2081_v29  ;;  %v2022_v46 = vor.u32 %v3007_v32, %v2019_v33 }
  0x19   :  { %456 = vmatpush.bf16.msra.mxu1 %v2098_v9  ;;  %475 = vmatpush.bf16.msra.mxu2 %v2038_v10  ;;  %v2203_v39 = vld [vmem:[%s4829_s1 + $0x78] sm:$0xf0]  ;;  %v3005_v43 = vld [vmem:[%s4829_s1 + $0xf4] sm:$0xf]  ;;  %v2086_v47 = vor.u32 %v3023_v34, %v2083_v35  ;;  %v2201_v49 = vld [vmem:[%s4829_s1 + $0x70] sm:$0xf]  ;;  %v158_v52 = vpack.c.bf16 %v3413_v37, %v3411_v36 }
  0x1a   :  { %494 = vmatpush.bf16.msra.mxu3 %v2102_v14  ;;  %v2267_v44 = vld [vmem:[%s4829_s1 + $0xf8] sm:$0xf0]  ;;  %v2206_v48 = vor.u32 %v2989_v38, %v2203_v39  ;;  %v2990_v50 = vld [vmem:[%s4829_s1 + $0x74] sm:$0xf0]  ;;  %v2265_v51 = vld [vmem:[%s4829_s1 + $0xf0] sm:$0xf]  ;;  %v159_v57 = vpack.c.bf16 %v3423_v42, %v3421_v41 }
  0x1b   :  { %v2270_v53 = vor.u32 %v3005_v43, %v2267_v44  ;;  %v3006_v54 = vld [vmem:[%s4829_s1 + $0xf4] sm:$0xf0]  ;;  %v2987_v55 = vld [vmem:[%s4829_s1 + $0x64] sm:$0xf]  ;;  %v2195_v56 = vld [vmem:[%s4829_s1 + $0x68] sm:$0xf0]  ;;  %v2202_v60 = vor.u32 %v2990_v50, %v2201_v49 }
  0x1c   :  { %438 = vmatpush.bf16.msra.mxu0 %v2026_v22  ;;  %v3003_v58 = vld [vmem:[%s4829_s1 + $0xe4] sm:$0xf]  ;;  %v2259_v59 = vld [vmem:[%s4829_s1 + $0xe8] sm:$0xf0]  ;;  %v2193_v61 = vld [vmem:[%s4829_s1 + $0x60] sm:$0xf]  ;;  %v2266_v62 = vor.u32 %v3006_v54, %v2265_v51  ;;  %v2198_v63 = vor.u32 %v2987_v55, %v2195_v56 }
  0x1d   :  { %457 = vmatpush.bf16.msra.mxu1 %v2090_v26  ;;  %476 = vmatpush.bf16.msra.mxu2 %v2030_v27  ;;  %v2988_v0 = vld [vmem:[%s4829_s1 + $0x64] sm:$0xf0]  ;;  %v2257_v1 = vld [vmem:[%s4829_s1 + $0xe0] sm:$0xf]  ;;  %v26_v4 = vld [vmem:[%s4830_s0 + $0x30] sm:$0xff]  ;;  %v2262_v5 = vor.u32 %v3003_v58, %v2259_v59 }
  0x1e   :  { %495 = vmatpush.bf16.msra.mxu3 %v2094_v31  ;;  %v3004_v2 = vld [vmem:[%s4829_s1 + $0xe4] sm:$0xf0]  ;;  %v24_v3 = vld [vmem:[%s4830_s0 + $0x20] sm:$0xff]  ;;  %v2985_v6 = vld [vmem:[%s4829_s1 + $0x54] sm:$0xf]  ;;  %v2194_v12 = vor.u32 %v2988_v0, %v2193_v61 }
  0x1f   :  { %v2187_v7 = vld [vmem:[%s4829_s1 + $0x58] sm:$0xf0]  ;;  %v3001_v8 = vld [vmem:[%s4829_s1 + $0xd4] sm:$0xf]  ;;  %v2185_v10 = vld [vmem:[%s4829_s1 + $0x50] sm:$0xf]  ;;  %v2258_v16 = vor.u32 %v3004_v2, %v2257_v1 }
  0x20   :  { %439 = vmatpush.bf16.msra.mxu0 %v2018_v40  ;;  %v2251_v9 = vld [vmem:[%s4829_s1 + $0xd8] sm:$0xf0]  ;;  %v2986_v11 = vld [vmem:[%s4829_s1 + $0x54] sm:$0xf0]  ;;  %v2249_v13 = vld [vmem:[%s4829_s1 + $0xd0] sm:$0xf]  ;;  %v2190_v17 = vor.u32 %v2985_v6, %v2187_v7 }
  0x21   :  { %458 = vmatpush.bf16.msra.mxu1 %v2082_v45  ;;  %477 = vmatpush.bf16.msra.mxu2 %v2022_v46  ;;  %v25_v14 = vld [vmem:[%s4830_s0 + $0x28] sm:$0xff]  ;;  %v27_v15 = vld [vmem:[%s4830_s0 + $0x38] sm:$0xff]  ;;  %v2983_v19 = vld [vmem:[%s4829_s1 + $0x44] sm:$0xf]  ;;  %v2254_v21 = vor.u32 %v3001_v8, %v2251_v9  ;;  %v93_v23 = vmul.f32 0.01, %v24_v3  ;;  %v2186_v28 = vor.u32 %v2986_v11, %v2185_v10 }
  0x22   :  { %496 = vmatpush.bf16.msra.mxu3 %v2086_v47  ;;  %v3002_v18 = vld [vmem:[%s4829_s1 + $0xd4] sm:$0xf0]  ;;  %v2179_v20 = vld [vmem:[%s4829_s1 + $0x48] sm:$0xf0]  ;;  %v2999_v22 = vld [vmem:[%s4829_s1 + $0xc4] sm:$0xf] }
  0x23   :  { %440 = vmatmul.bf16.vlgmr.msra.gmra.mxu0 %v158_v52  ;;  %v95_v24 = vmul.f32 0.01, %v26_v4  ;;  %v2243_v25 = vld [vmem:[%s4829_s1 + $0xc8] sm:$0xf0]  ;;  %v94_v26 = vmul.f32 0.01, %v25_v14  ;;  %v2250_v29 = vor.u32 %v3002_v18, %v2249_v13  ;;  %v2182_v30 = vor.u32 %v2983_v19, %v2179_v20 }
  0x24   :  { %459 = vmatmul.bf16.vlgmr.msra.gmra.mxu1 %v159_v57  ;;  %478 = vmatmul.bf16.vlgmr.msra.gmra.mxu2 %v158_v52  ;;  %v96_v27 = vmul.f32 0.01, %v27_v15  ;;  %v2177_v31 = vld [vmem:[%s4829_s1 + $0x40] sm:$0xf]  ;;  %v2984_v32 = vld [vmem:[%s4829_s1 + $0x44] sm:$0xf0]  ;;  %v2246_v34 = vor.u32 %v2999_v22, %v2243_v25  ;;  %v3531_v38 = vmax.f32 %v24_v3, %v93_v23 }
  0x25   :  { %706 = vmatpush.bf16.msrb.mxu2 %v2206_v48  ;;  %497 = vmatmul.bf16.vlgmr.msra.gmra.mxu3 %v159_v57  ;;  %v2241_v33 = vld [vmem:[%s4829_s1 + $0xc0] sm:$0xf]  ;;  %v3000_v35 = vld [vmem:[%s4829_s1 + $0xc4] sm:$0xf0]  ;;  %v3533_v39 = vmax.f32 %v26_v4, %v95_v24  ;;  %v2981_v40 = vld [vmem:[%s4829_s1 + $0x34] sm:$0xf]  ;;  %v3541_v44 = vmax.f32 %v25_v14, %v94_v26  ;;  %v2178_v48 = vor.u32 %v2984_v32, %v2177_v31 }
  0x26   :  { %725 = vmatpush.bf16.msrb.mxu3 %v2270_v53  ;;  %668 = vmatpush.bf16.msrb.mxu0 %v2202_v60  ;;  %v2171_v43 = vld [vmem:[%s4829_s1 + $0x38] sm:$0xf0]  ;;  %v3543_v45 = vmax.f32 %v27_v15, %v96_v27  ;;  %v2997_v46 = vld [vmem:[%s4829_s1 + $0xb4] sm:$0xf]  ;;  %v2242_v49 = vor.u32 %v3000_v35, %v2241_v33  ;;  %v2169_v51 = vld [vmem:[%s4829_s1 + $0x30] sm:$0xf] }
  0x27   :  { %687 = vmatpush.bf16.msrb.mxu1 %v2266_v62  ;;  %v2235_v47 = vld [vmem:[%s4829_s1 + $0xb8] sm:$0xf0]  ;;  %v2174_v50 = vor.u32 %v2981_v40, %v2171_v43  ;;  %v2982_v52 = vld [vmem:[%s4829_s1 + $0x34] sm:$0xf0]  ;;  %v2233_v53 = vld [vmem:[%s4829_s1 + $0xb0] sm:$0xf]  ;;  %v160_v54 = vpack.c.bf16 %v3533_v39, %v3531_v38 }
  0x28   :  { %v2238_v55 = vor.u32 %v2997_v46, %v2235_v47  ;;  %v2998_v56 = vld [vmem:[%s4829_s1 + $0xb4] sm:$0xf0]  ;;  %v2979_v57 = vld [vmem:[%s4829_s1 + $0x24] sm:$0xf]  ;;  %v2163_v58 = vld [vmem:[%s4829_s1 + $0x28] sm:$0xf0]  ;;  %v161_v59 = vpack.c.bf16 %v3543_v45, %v3541_v44  ;;  %v2170_v62 = vor.u32 %v2982_v52, %v2169_v51 }
  0x29   :  { %707 = vmatpush.bf16.msrb.mxu2 %v2198_v63  ;;  %v2995_v60 = vld [vmem:[%s4829_s1 + $0xa4] sm:$0xf]  ;;  %v2227_v61 = vld [vmem:[%s4829_s1 + $0xa8] sm:$0xf0]  ;;  %v2161_v63 = vld [vmem:[%s4829_s1 + $0x20] sm:$0xf]  ;;  %v2234_v0 = vor.u32 %v2998_v56, %v2233_v53  ;;  %v2166_v1 = vor.u32 %v2979_v57, %v2163_v58 }
  0x2a   :  { %726 = vmatpush.bf16.msrb.mxu3 %v2262_v5  ;;  %669 = vmatpush.bf16.msrb.mxu0 %v2194_v12  ;;  %v2980_v2 = vld [vmem:[%s4829_s1 + $0x24] sm:$0xf0]  ;;  %v2225_v3 = vld [vmem:[%s4829_s1 + $0xa0] sm:$0xf]  ;;  %v28_v5 = vlaneseq  ;;  %v2230_v6 = vor.u32 %v2995_v60, %v2227_v61  ;;  %v2977_v7 = vld [vmem:[%s4829_s1 + $0x14] sm:$0xf] }
  0x2b   :  { %688 = vmatpush.bf16.msrb.mxu1 %v2258_v16  ;;  %v2996_v4 = vld [vmem:[%s4829_s1 + $0xa4] sm:$0xf0]  ;;  %v2155_v8 = vld [vmem:[%s4829_s1 + $0x18] sm:$0xf0]  ;;  %v2993_v9 = vld [vmem:[%s4829_s1 + $0x94] sm:$0xf]  ;;  %v2162_v13 = vor.u32 %v2980_v2, %v2161_v63 }
  0x2c   :  { %v2219_v10 = vld [vmem:[%s4829_s1 + $0x98] sm:$0xf0]  ;;  %v2153_v11 = vld [vmem:[%s4829_s1 + $0x10] sm:$0xf]  ;;  %v2978_v12 = vld [vmem:[%s4829_s1 + $0x14] sm:$0xf0]  ;;  %v2226_v18 = vor.u32 %v2996_v4, %v2225_v3  ;;  %v2158_v19 = vor.u32 %v2977_v7, %v2155_v8 }
  0x2d   :  { %708 = vmatpush.bf16.msrb.mxu2 %v2190_v17  ;;  %v2217_v14 = vld [vmem:[%s4829_s1 + $0x90] sm:$0xf]  ;;  %v2994_v15 = vld [vmem:[%s4829_s1 + $0x94] sm:$0xf0]  ;;  %v2975_v16 = vld [vmem:[%s4829_s1 + $0x4] sm:$0xf]  ;;  %v2222_v23 = vor.u32 %v2993_v9, %v2219_v10  ;;  %v2154_v31 = vor.u32 %v2978_v12, %v2153_v11 }
  0x2e   :  { %727 = vmatpush.bf16.msrb.mxu3 %v2254_v21  ;;  %670 = vmatpush.bf16.msrb.mxu0 %v2186_v28  ;;  %v116_v17 = vrot.slane %v3413_v37, 7  ;;  %v2147_v20 = vld [vmem:[%s4829_s1 + $0x8] sm:$0xf0]  ;;  %v2991_v21 = vld [vmem:[%s4829_s1 + $0x84] sm:$0xf]  ;;  %v3625_v22 = vshrl.u32 %v28_v5, 7  ;;  %v2218_v32 = vor.u32 %v2994_v15, %v2217_v14 }
  0x2f   :  { %689 = vmatpush.bf16.msrb.mxu1 %v2250_v29  ;;  %v2211_v24 = vld [vmem:[%s4829_s1 + $0x88] sm:$0xf0]  ;;  %v2145_v25 = vld [vmem:[%s4829_s1] sm:$0xf]  ;;  %v2976_v26 = vld [vmem:[%s4829_s1 + $0x4] sm:$0xf0]  ;;  %v2150_v40 = vor.u32 %v2975_v16, %v2147_v20 }
  0x30   :  { %v2209_v27 = vld [vmem:[%s4829_s1 + $0x80] sm:$0xf]  ;;  %v3053_v28 = vld [vmem:[%s4829_s1 + $0x274] sm:$0xf]  ;;  %v2387_v29 = vld [vmem:[%s4829_s1 + $0x278] sm:$0xf0]  ;;  %v2146_v53 = vor.u32 %v2976_v26, %v2145_v25 }
  0x31   :  { %709 = vmatpush.bf16.msrb.mxu2 %v2182_v30  ;;  %v118_v30 = vrot.slane %v3423_v42, 7  ;;  %v114_v33 = vrot.slane %v3411_v36, 7  ;;  %v2451_v35 = vld [vmem:[%s4829_s1 + $0x2f8] sm:$0xf0]  ;;  %v2992_v43 = vld [vmem:[%s4829_s1 + $0x84] sm:$0xf0] }
  0x32   :  { %728 = vmatpush.bf16.msrb.mxu3 %v2246_v34  ;;  %671 = vmatpush.bf16.msrb.mxu0 %v2178_v48  ;;  %v3069_v34 = vld [vmem:[%s4829_s1 + $0x2f4] sm:$0xf]  ;;  %v37_v46 = vand.u32 15, %v3625_v22  ;;  %v115_v47 = vrot.slane %v3421_v41, 7  ;;  %v2214_v48 = vor.u32 %v2991_v21, %v2211_v24  ;;  %v3054_v51 = vld [vmem:[%s4829_s1 + $0x274] sm:$0xf0]  ;;  %v2210_v58 = vor.u32 %v2992_v43, %v2209_v27 }
  0x33   :  { %690 = vmatpush.bf16.msrb.mxu1 %v2242_v49  ;;  %445 = vmatmul.bf16.gmra.mxu0 %v160_v54  ;;  %v2390_v49 = vor.u32 %v3053_v28, %v2387_v29  ;;  %v2449_v52 = vld [vmem:[%s4829_s1 + $0x2f0] sm:$0xf]  ;;  %v3051_v56 = vld [vmem:[%s4829_s1 + $0x264] sm:$0xf]  ;;  %v2379_v57 = vld [vmem:[%s4829_s1 + $0x268] sm:$0xf0] }
  0x34   :  { %464 = vmatmul.bf16.gmra.mxu1 %v161_v59  ;;  %483 = vmatmul.bf16.gmra.mxu2 %v160_v54  ;;  %v2454_v54 = vor.u32 %v3069_v34, %v2451_v35  ;;  %v136_v60 = vsel %vm113_vm0, 0.0, %v114_v33  ;;  %vm3680_vm1 = vcmp.ne.s32.totalorder %v37_v46, 0  ;;  %v137_v63 = vsel %vm113_vm0, 0.0, %v115_v47  ;;  %v2443_v2 = vld [vmem:[%s4829_s1 + $0x2e8] sm:$0xf0] }
  0x35   :  { %710 = vmatpush.bf16.msrb.mxu2 %v2174_v50  ;;  %502 = vmatmul.bf16.gmra.mxu3 %v161_v59  ;;  %v2385_v50 = vld [vmem:[%s4829_s1 + $0x270] sm:$0xf]  ;;  %v117_v59 = vsel %vm113_vm0, %v114_v33, %v116_v17  ;;  %v2382_v4 = vor.u32 %v3051_v56, %v2379_v57  ;;  %v2377_v5 = vld [vmem:[%s4829_s1 + $0x260] sm:$0xf]  ;;  %v3068_v9 = vld [vmem:[%s4829_s1 + $0x2e4] sm:$0xf0] }
  0x36   :  { %729 = vmatpush.bf16.msrb.mxu3 %v2238_v55  ;;  %672 = vmatpush.bf16.msrb.mxu0 %v2170_v62  ;;  %v3070_v55 = vld [vmem:[%s4829_s1 + $0x2f4] sm:$0xf0]  ;;  %v119_v62 = vsel %vm113_vm0, %v115_v47, %v118_v30  ;;  %v2441_v7 = vld [vmem:[%s4829_s1 + $0x2e0] sm:$0xf]  ;;  %v2272_v8 = vpack.c.bf16 %v117_v59, %v136_v60  ;;  %v3049_v10 = vld [vmem:[%s4829_s1 + $0x254] sm:$0xf] }
  0x37   :  { %691 = vmatpush.bf16.msrb.mxu1 %v2234_v0  ;;  %v2386_v0 = vor.u32 %v3054_v51, %v2385_v50  ;;  %v2450_v3 = vor.u32 %v3070_v55, %v2449_v52  ;;  %v2371_v11 = vld [vmem:[%s4829_s1 + $0x258] sm:$0xf0]  ;;  %vm3715_vm3 = vmpackc.low %vm3176_vm2, %vm3680_vm1  ;;  %v3065_v16 = vld [vmem:[%s4829_s1 + $0x2d4] sm:$0xf]  ;;  %v31_v33 = vadd.s32 16, %v3625_v22  ;;  %v120_v50 = vrot.slane %v3531_v38, 7 }
  0x38   :  { %v2374_v20 = vor.u32 %v3049_v10, %v2371_v11  ;;  %v2369_v21 = vld [vmem:[%s4829_s1 + $0x250] sm:$0xf]  ;;  %v3066_v25 = vld [vmem:[%s4829_s1 + $0x2d4] sm:$0xf0]  ;;  %v3047_v26 = vld [vmem:[%s4829_s1 + $0x244] sm:$0xf] }
  0x39   :  { %711 = vmatpush.bf16.msrb.mxu2 %v2166_v1  ;;  %v3067_v1 = vld [vmem:[%s4829_s1 + $0x2e4] sm:$0xf]  ;;  %v2433_v24 = vld [vmem:[%s4829_s1 + $0x2d0] sm:$0xf]  ;;  %v2363_v27 = vld [vmem:[%s4829_s1 + $0x248] sm:$0xf0] }
  0x3a   :  { %730 = vmatpush.bf16.msrb.mxu3 %v2230_v6  ;;  %673 = vmatpush.bf16.msrb.mxu0 %v2162_v13  ;;  %v3052_v6 = vld [vmem:[%s4829_s1 + $0x264] sm:$0xf0]  ;;  %v2278_v13 = vpack.c.bf16 %v119_v62, %v137_v63  ;;  %v2446_v14 = vor.u32 %v3067_v1, %v2443_v2  ;;  %v2434_v34 = vor.u32 %v3066_v25, %v2433_v24  ;;  %v2425_v46 = vld [vmem:[%s4829_s1 + $0x2c0] sm:$0xf]  ;;  %v124_v51 = vrot.slane %v3533_v39, 7 }
  0x3b   :  { %692 = vmatpush.bf16.msrb.mxu1 %v2226_v18  ;;  %v2378_v15 = vor.u32 %v3052_v6, %v2377_v5  ;;  %v2435_v18 = vld [vmem:[%s4829_s1 + $0x2d8] sm:$0xf0]  ;;  %v2366_v35 = vor.u32 %v3047_v26, %v2363_v27  ;;  %v3048_v43 = vld [vmem:[%s4829_s1 + $0x244] sm:$0xf0]  ;;  %v122_v52 = vrot.slane %v3541_v44, 7  ;;  %v51_v55 = vand.u32 15, %v31_v33 }
  0x3c   :  { %v2438_v28 = vor.u32 %v3065_v16, %v2435_v18  ;;  %v3064_v47 = vld [vmem:[%s4829_s1 + $0x2c4] sm:$0xf0]  ;;  %v126_v56 = vrot.slane %v3543_v45, 7  ;;  %v3061_v57 = vld [vmem:[%s4829_s1 + $0x2b4] sm:$0xf]  ;;  %v175_v6 = vrot.slane %v3543_v45, 1 }
  0x3d   :  { %712 = vmatpush.bf16.msrb.mxu2 %v2158_v19  ;;  %v2442_v19 = vor.u32 %v3068_v9, %v2441_v7  ;;  %v2426_v59 = vor.u32 %v3064_v47, %v2425_v46  ;;  %v2353_v61 = vld [vmem:[%s4829_s1 + $0x230] sm:$0xf]  ;;  %v3046_v62 = vld [vmem:[%s4829_s1 + $0x234] sm:$0xf0]  ;;  %v3043_v1 = vld [vmem:[%s4829_s1 + $0x224] sm:$0xf]  ;;  %v123_v5 = vsel %vm113_vm0, %v118_v30, %v122_v52 }
  0x3e   :  { %731 = vmatpush.bf16.msrb.mxu3 %v2222_v23  ;;  %674 = vmatpush.bf16.msrb.mxu0 %v2154_v31  ;;  %v3050_v23 = vld [vmem:[%s4829_s1 + $0x254] sm:$0xf0]  ;;  %v3063_v31 = vld [vmem:[%s4829_s1 + $0x2c4] sm:$0xf]  ;;  %v2417_v63 = vld [vmem:[%s4829_s1 + $0x2b0] sm:$0xf]  ;;  %v127_v7 = vsel %vm113_vm0, %v122_v52, %v126_v56  ;;  %v2354_v9 = vor.u32 %v3046_v62, %v2353_v61 }
  0x3f   :  { %693 = vmatpush.bf16.msrb.mxu1 %v2218_v32  ;;  %v2370_v29 = vor.u32 %v3050_v23, %v2369_v21  ;;  %v2427_v32 = vld [vmem:[%s4829_s1 + $0x2c8] sm:$0xf0]  ;;  %vm3811_vm4 = vcmp.ne.s32.totalorder %v51_v55, 0  ;;  %v3060_v18 = vld [vmem:[%s4829_s1 + $0x2a4] sm:$0xf0]  ;;  %v2281_v23 = vpack.c.bf16 %v127_v7, %v123_v5  ;;  %v164_v55 = vrot.slane %v3413_v37, 1 }
  0x40   :  { %v2347_v2 = vld [vmem:[%s4829_s1 + $0x228] sm:$0xf0]  ;;  %vm3843_vm5 = vmpackc.low %vm3176_vm2, %vm3811_vm4  ;;  %v3057_v26 = vld [vmem:[%s4829_s1 + $0x294] sm:$0xf]  ;;  %v171_v61 = vrot.slane %v3541_v44, 1 }
  0x41   :  { %713 = vmatpush.bf16.msrb.mxu2 %v2150_v40  ;;  %v2361_v40 = vld [vmem:[%s4829_s1 + $0x240] sm:$0xf]  ;;  %v2411_v10 = vld [vmem:[%s4829_s1 + $0x2a8] sm:$0xf0]  ;;  %v2350_v11 = vor.u32 %v3043_v1, %v2347_v2  ;;  %v2403_v27 = vld [vmem:[%s4829_s1 + $0x298] sm:$0xf0] }
  0x42   :  { %732 = vmatpush.bf16.msrb.mxu3 %v2214_v48  ;;  %675 = vmatpush.bf16.msrb.mxu0 %v2146_v53  ;;  %v3045_v48 = vld [vmem:[%s4829_s1 + $0x234] sm:$0xf]  ;;  %v2430_v53 = vor.u32 %v3063_v31, %v2427_v32  ;;  %v2337_v31 = vld [vmem:[%s4829_s1 + $0x210] sm:$0xf]  ;;  %v3042_v32 = vld [vmem:[%s4829_s1 + $0x214] sm:$0xf0] }
  0x43   :  { %694 = vmatpush.bf16.msrb.mxu1 %v2210_v58  ;;  %v2419_v58 = vld [vmem:[%s4829_s1 + $0x2b8] sm:$0xf0]  ;;  %v2401_v33 = vld [vmem:[%s4829_s1 + $0x290] sm:$0xf]  ;;  %v2338_v46 = vor.u32 %v3042_v32, %v2337_v31  ;;  %v3055_v47 = vld [vmem:[%s4829_s1 + $0x284] sm:$0xf] }
  0x44   :  { %2285 = vmatmul.msk.bf16.vlgmr.msrb.gmra.mxu2 %vm3715_vm3, %v2272_v8  ;;  %v2329_v52 = vld [vmem:[%s4829_s1 + $0x200] sm:$0xf]  ;;  %v2571_v31 = vld [vmem:[%s4831_s3 + $0x178] sm:$0xf0] }
  0x45   :  { %975 = vmatpush.bf16.msra.mxu2 %v2390_v49  ;;  %2273 = vmatmul.msk.bf16.vlgmr.msrb.gmra.mxu0 %vm3715_vm3, %v2272_v8  ;;  %v2355_v49 = vld [vmem:[%s4829_s1 + $0x238] sm:$0xf0]  ;;  %v2422_v8 = vor.u32 %v3061_v57, %v2419_v58  ;;  %v2393_v56 = vld [vmem:[%s4829_s1 + $0x280] sm:$0xf]  ;;  %v3056_v57 = vld [vmem:[%s4829_s1 + $0x284] sm:$0xf0] }
  0x46   :  { %994 = vmatpush.bf16.msra.mxu3 %v2454_v54  ;;  %937 = vmatpush.bf16.msra.mxu0 %v2386_v0  ;;  %v2362_v54 = vor.u32 %v3048_v43, %v2361_v40  ;;  %v2358_v60 = vor.u32 %v3045_v48, %v2355_v49  ;;  %v3062_v0 = vld [vmem:[%s4829_s1 + $0x2b4] sm:$0xf0]  ;;  %v2331_v40 = vld [vmem:[%s4829_s1 + $0x208] sm:$0xf0]  ;;  %v2406_v43 = vor.u32 %v3057_v26, %v2403_v27  ;;  %v30_v48 = vadd.s32 8, %v3625_v22 }
  0x47   :  { %956 = vmatpush.bf16.msra.mxu1 %v2450_v3  ;;  %2291 = vmatmul.msk.bf16.vlgmr.msrb.gmra.mxu3 %vm3715_vm3, %v2278_v13  ;;  %v121_v3 = vsel %vm113_vm0, %v116_v17, %v120_v50  ;;  %v3059_v17 = vld [vmem:[%s4829_s1 + $0x2a4] sm:$0xf]  ;;  %v2418_v30 = vor.u32 %v3062_v0, %v2417_v63  ;;  %v166_v58 = vrot.slane %v3421_v41, 1  ;;  %v2394_v63 = vor.u32 %v3056_v57, %v2393_v56  ;;  %v2569_v26 = vld [vmem:[%s4831_s3 + $0x170] sm:$0xf] }
  0x48   :  { %2279 = vmatmul.msk.bf16.vlgmr.msrb.gmra.mxu1 %vm3715_vm3, %v2278_v13  ;;  %v2345_v13 = vld [vmem:[%s4829_s1 + $0x220] sm:$0xf]  ;;  %v2414_v24 = vor.u32 %v3059_v17, %v2411_v10  ;;  %v44_v62 = vand.u32 15, %v30_v48  ;;  %v186_v17 = vsel %vm162_vm6, %v175_v6, 0.0  ;;  %v3118_v27 = vld [vmem:[%s4831_s3 + $0x174] sm:$0xf0] }
  0x49   :  { %976 = vmatpush.bf16.msra.mxu2 %v2382_v4  ;;  %v125_v4 = vsel %vm113_vm0, %v120_v50, %v124_v51  ;;  %v2395_v51 = vld [vmem:[%s4829_s1 + $0x288] sm:$0xf0]  ;;  %v3115_v48 = vld [vmem:[%s4831_s3 + $0x164] sm:$0xf]  ;;  %v3134_v56 = vld [vmem:[%s4831_s3 + $0x1f4] sm:$0xf0] }
  0x4a   :  { %995 = vmatpush.bf16.msra.mxu3 %v2446_v14  ;;  %938 = vmatpush.bf16.msra.mxu0 %v2378_v15  ;;  %v3044_v14 = vld [vmem:[%s4829_s1 + $0x224] sm:$0xf0]  ;;  %v2409_v15 = vld [vmem:[%s4829_s1 + $0x2a0] sm:$0xf]  ;;  %v2275_v16 = vpack.c.bf16 %v125_v4, %v121_v3  ;;  %vm86_vm7 = vcmp.ne.s32.totalorder %v44_v62, 15  ;;  %v32_v3 = vadd.s32 24, %v3625_v22 }
  0x4b   :  { %957 = vmatpush.bf16.msra.mxu1 %v2442_v19  ;;  %v3041_v19 = vld [vmem:[%s4829_s1 + $0x214] sm:$0xf]  ;;  %v2346_v25 = vor.u32 %v3044_v14, %v2345_v13  ;;  %vm3909_vm8 = vmpackc.low %vm86_vm7, %vm3176_vm2  ;;  %v173_v4 = vrot.slane %v3533_v39, 1 }
  0x4c   :  { %v58_v5 = vand.u32 15, %v32_v3 }
  0x4d   :  { %977 = vmatpush.bf16.msra.mxu2 %v2374_v20  ;;  %v2339_v20 = vld [vmem:[%s4829_s1 + $0x218] sm:$0xf0] }
  0x4e   :  { %996 = vmatpush.bf16.msra.mxu3 %v2438_v28  ;;  %939 = vmatpush.bf16.msra.mxu0 %v2370_v29  ;;  %v2410_v28 = vor.u32 %v3060_v18, %v2409_v15  ;;  %v2342_v29 = vor.u32 %v3041_v19, %v2339_v20  ;;  %vm88_vm9 = vcmp.ne.s32.totalorder %v58_v5, 15  ;;  %v3112_v5 = vld [vmem:[%s4831_s3 + $0x144] sm:$0xf0] }
  0x4f   :  { %958 = vmatpush.bf16.msra.mxu1 %v2434_v34  ;;  %v3058_v34 = vld [vmem:[%s4829_s1 + $0x294] sm:$0xf0]  ;;  %vm3929_vm10 = vmpackc.low %vm88_vm9, %vm3176_vm2 }
  0x50   :  { %v2402_v49 = vor.u32 %v3058_v34, %v2401_v33 }
  0x51   :  { %978 = vmatpush.bf16.msra.mxu2 %v2366_v35  ;;  %v3039_v35 = vld [vmem:[%s4829_s1 + $0x204] sm:$0xf] }
  0x52   :  { %997 = vmatpush.bf16.msra.mxu3 %v2430_v53  ;;  %940 = vmatpush.bf16.msra.mxu0 %v2362_v54  ;;  %v2334_v50 = vor.u32 %v3039_v35, %v2331_v40  ;;  %v3040_v53 = vld [vmem:[%s4829_s1 + $0x204] sm:$0xf0]  ;;  %v163_v54 = vrot.slane %v3411_v36, 1  ;;  %v2398_v36 = vor.u32 %v3055_v47, %v2395_v51 }
  0x53   :  { %959 = vmatpush.bf16.msra.mxu1 %v2426_v59  ;;  %v167_v59 = vrot.slane %v3423_v42, 1  ;;  %v2330_v37 = vor.u32 %v3040_v53, %v2329_v52  ;;  %v3116_v47 = vld [vmem:[%s4831_s3 + $0x164] sm:$0xf0]  ;;  %v3133_v52 = vld [vmem:[%s4831_s3 + $0x1f4] sm:$0xf] }
  0x54   :  { %2288 = vmatmul.msk.bf16.gmra.mxu2 %vm3843_vm5, %v2275_v16  ;;  %v165_v0 = vsel %vm162_vm6, %v163_v54, %v164_v55  ;;  %v2635_v53 = vld [vmem:[%s4831_s3 + $0x1f8] sm:$0xf0]  ;;  %v2633_v54 = vld [vmem:[%s4831_s3 + $0x1f0] sm:$0xf] }
  0x55   :  { %979 = vmatpush.bf16.msra.mxu2 %v2358_v60  ;;  %2276 = vmatmul.msk.bf16.gmra.mxu0 %vm3843_vm5, %v2275_v16  ;;  %v169_v60 = vrot.slane %v3531_v38, 1  ;;  %v168_v41 = vsel %vm162_vm6, %v166_v58, %v167_v59  ;;  %v172_v42 = vsel %vm162_vm6, %v167_v59, %v171_v61  ;;  %v2634_v57 = vor.u32 %v3134_v56, %v2633_v54  ;;  %v2553_v58 = vld [vmem:[%s4831_s3 + $0x150] sm:$0xf]  ;;  %v3114_v59 = vld [vmem:[%s4831_s3 + $0x154] sm:$0xf0] }
  0x56   :  { %998 = vmatpush.bf16.msra.mxu3 %v2422_v8  ;;  %941 = vmatpush.bf16.msra.mxu0 %v2354_v9  ;;  %v2462_v2 = vpack.c.bf16 %v172_v42, %v168_v41  ;;  %v185_v8 = vsel %vm162_vm6, %v173_v4, 0.0  ;;  %v176_v9 = vsel %vm162_vm6, %v171_v61, %v175_v6  ;;  %v2554_v61 = vor.u32 %v3114_v59, %v2553_v58  ;;  %v3111_v6 = vld [vmem:[%s4831_s3 + $0x144] sm:$0xf]  ;;  %v2531_v56 = vld [vmem:[%s4831_s3 + $0x128] sm:$0xf0] }
  0x57   :  { %960 = vmatpush.bf16.msra.mxu1 %v2418_v30  ;;  %2294 = vmatmul.msk.bf16.gmra.mxu3 %vm3843_vm5, %v2281_v23  ;;  %v170_v1 = vsel %vm162_vm6, %v164_v55, %v169_v60  ;;  %v174_v7 = vsel %vm162_vm6, %v169_v60, %v173_v4  ;;  %v2465_v22 = vpack.c.bf16 %v186_v17, %v176_v9  ;;  %v3113_v60 = vld [vmem:[%s4831_s3 + $0x154] sm:$0xf]  ;;  %v2545_v4 = vld [vmem:[%s4831_s3 + $0x140] sm:$0xf]  ;;  %v2547_v9 = vld [vmem:[%s4831_s3 + $0x148] sm:$0xf0] }
  0x58   :  { %2282 = vmatmul.msk.bf16.gmra.mxu1 %vm3843_vm5, %v2281_v23  ;;  %v2456_v38 = vpack.c.bf16 %v170_v1, %v165_v0  ;;  %v2459_v10 = vpack.c.bf16 %v185_v8, %v174_v7  ;;  %v2638_v55 = vor.u32 %v3133_v52, %v2635_v53  ;;  %v2627_v0 = vld [vmem:[%s4831_s3 + $0x1e8] sm:$0xf0]  ;;  %v2625_v1 = vld [vmem:[%s4831_s3 + $0x1e0] sm:$0xf]  ;;  %v2546_v8 = vor.u32 %v3112_v5, %v2545_v4  ;;  %v3108_v52 = vld [vmem:[%s4831_s3 + $0x124] sm:$0xf0] }
  0x59   :  { %980 = vmatpush.bf16.msra.mxu2 %v2350_v11  ;;  %v2550_v17 = vor.u32 %v3111_v6, %v2547_v9  ;;  %v3107_v53 = vld [vmem:[%s4831_s3 + $0x124] sm:$0xf]  ;;  %v3125_v58 = vld [vmem:[%s4831_s3 + $0x1b4] sm:$0xf]  ;;  %v2603_v59 = vld [vmem:[%s4831_s3 + $0x1b8] sm:$0xf0] }
  0x5a   :  { %999 = vmatpush.bf16.msra.mxu3 %v2414_v24  ;;  %942 = vmatpush.bf16.msra.mxu0 %v2346_v25  ;;  %v3123_v5 = vld [vmem:[%s4831_s3 + $0x1a4] sm:$0xf]  ;;  %v2595_v6 = vld [vmem:[%s4831_s3 + $0x1a8] sm:$0xf0] }
  0x5b   :  { %961 = vmatpush.bf16.msra.mxu1 %v2410_v28  ;;  %v3117_v28 = vld [vmem:[%s4831_s3 + $0x174] sm:$0xf]  ;;  %v2598_v9 = vor.u32 %v3123_v5, %v2595_v6  ;;  %v2691_v5 = vld [vmem:[%s4831_s3 + $0x68] sm:$0xf0] }
  0x5c   :  { %v2574_v33 = vor.u32 %v3117_v28, %v2571_v31  ;;  %v2539_v28 = vld [vmem:[%s4831_s3 + $0x138] sm:$0xf0] }
  0x5d   :  { %981 = vmatpush.bf16.msra.mxu2 %v2342_v29  ;;  %v2570_v29 = vor.u32 %v3118_v27, %v2569_v26  ;;  %v3109_v27 = vld [vmem:[%s4831_s3 + $0x134] sm:$0xf] }
  0x5e   :  { %1000 = vmatpush.bf16.msra.mxu3 %v2406_v43  ;;  %943 = vmatpush.bf16.msra.mxu0 %v2338_v46  ;;  %v2561_v46 = vld [vmem:[%s4831_s3 + $0x160] sm:$0xf]  ;;  %v2542_v31 = vor.u32 %v3109_v27, %v2539_v28  ;;  %v3121_v28 = vld [vmem:[%s4831_s3 + $0x194] sm:$0xf] }
  0x5f   :  { %962 = vmatpush.bf16.msra.mxu1 %v2402_v49  ;;  %v2562_v49 = vor.u32 %v3116_v47, %v2561_v46 }
  0x61   :  { %982 = vmatpush.bf16.msra.mxu2 %v2334_v50  ;;  %v2563_v50 = vld [vmem:[%s4831_s3 + $0x168] sm:$0xf0] }
  0x62   :  { %1001 = vmatpush.bf16.msra.mxu3 %v2398_v36  ;;  %944 = vmatpush.bf16.msra.mxu0 %v2330_v37  ;;  %v2566_v51 = vor.u32 %v3115_v48, %v2563_v50  ;;  %v2555_v36 = vld [vmem:[%s4831_s3 + $0x158] sm:$0xf0]  ;;  %v3128_v48 = vld [vmem:[%s4831_s3 + $0x1c4] sm:$0xf0] }
  0x63   :  { %963 = vmatpush.bf16.msra.mxu1 %v2394_v63  ;;  %v2558_v62 = vor.u32 %v3113_v60, %v2555_v36  ;;  %v3131_v63 = vld [vmem:[%s4831_s3 + $0x1e4] sm:$0xf]  ;;  %v2606_v60 = vor.u32 %v3125_v58, %v2603_v59  ;;  %v3126_v36 = vld [vmem:[%s4831_s3 + $0x1b4] sm:$0xf0]  ;;  %v2579_v59 = vld [vmem:[%s4831_s3 + $0x188] sm:$0xf0] }
  0x64   :  { %2469 = vmatmul.msk.bf16.vlgmr.msra.gmra.mxu2 %vm3909_vm8, %v2456_v38  ;;  %v2630_v42 = vor.u32 %v3131_v63, %v2627_v0  ;;  %v2521_v63 = vld [vmem:[%s4831_s3 + $0x110] sm:$0xf]  ;;  %v3106_v0 = vld [vmem:[%s4831_s3 + $0x114] sm:$0xf0]  ;;  %v3119_v58 = vld [vmem:[%s4831_s3 + $0x184] sm:$0xf] }
  0x65   :  { %2457 = vmatmul.msk.bf16.vlgmr.msra.gmra.mxu0 %vm3909_vm8, %v2456_v38  ;;  %1398 = vmatpush.bf16.msrb.mxu2 %v2574_v33  ;;  %v3132_v38 = vld [vmem:[%s4831_s3 + $0x1e4] sm:$0xf0]  ;;  %v2611_v33 = vld [vmem:[%s4831_s3 + $0x1c8] sm:$0xf0] }
  0x66   :  { %1360 = vmatpush.bf16.msrb.mxu0 %v2570_v29  ;;  %1417 = vmatpush.bf16.msrb.mxu3 %v2638_v55  ;;  %v2626_v3 = vor.u32 %v3132_v38, %v2625_v1  ;;  %v3105_v1 = vld [vmem:[%s4831_s3 + $0x114] sm:$0xf]  ;;  %v2523_v38 = vld [vmem:[%s4831_s3 + $0x118] sm:$0xf0] }
  0x67   :  { %2475 = vmatmul.msk.bf16.vlgmr.msra.gmra.mxu3 %vm3909_vm8, %v2462_v2  ;;  %1379 = vmatpush.bf16.msrb.mxu1 %v2634_v57  ;;  %v2534_v57 = vor.u32 %v3107_v53, %v2531_v56  ;;  %v2526_v4 = vor.u32 %v3105_v1, %v2523_v38  ;;  %v2689_v1 = vld [vmem:[%s4831_s3 + $0x60] sm:$0xf]  ;;  %v3083_v38 = vld [vmem:[%s4831_s3 + $0x64] sm:$0xf] }
  0x68   :  { %2463 = vmatmul.msk.bf16.vlgmr.msra.gmra.mxu1 %vm3909_vm8, %v2462_v2  ;;  %v2694_v6 = vor.u32 %v3083_v38, %v2691_v5  ;;  %v2747_v38 = vld [vmem:[%s4831_s3 + $0xd8] sm:$0xf0] }
  0x69   :  { %1399 = vmatpush.bf16.msrb.mxu2 %v2566_v51  ;;  %v2529_v51 = vld [vmem:[%s4831_s3 + $0x120] sm:$0xf] }
  0x6a   :  { %1361 = vmatpush.bf16.msrb.mxu0 %v2562_v49  ;;  %1418 = vmatpush.bf16.msrb.mxu3 %v2630_v42  ;;  %v2530_v55 = vor.u32 %v3108_v52, %v2529_v51  ;;  %v2522_v42 = vor.u32 %v3106_v0, %v2521_v63  ;;  %v3085_v51 = vld [vmem:[%s4831_s3 + $0x74] sm:$0xf] }
  0x6b   :  { %1380 = vmatpush.bf16.msrb.mxu1 %v2626_v3 }
  0x6d   :  { %1400 = vmatpush.bf16.msrb.mxu2 %v2558_v62 }
  0x6e   :  { %1362 = vmatpush.bf16.msrb.mxu0 %v2554_v61  ;;  %v2601_v61 = vld [vmem:[%s4831_s3 + $0x1b0] sm:$0xf] }
  0x6f   :  { %v2602_v62 = vor.u32 %v3126_v36, %v2601_v61  ;;  %v2582_v36 = vor.u32 %v3119_v58, %v2579_v59 }
  0x71   :  { %1401 = vmatpush.bf16.msrb.mxu2 %v2550_v17  ;;  %v2593_v17 = vld [vmem:[%s4831_s3 + $0x1a0] sm:$0xf] }
  0x72   :  { %1363 = vmatpush.bf16.msrb.mxu0 %v2546_v8 }
  0x74   :  { %2472 = vmatmul.msk.bf16.gmra.mxu2 %vm3929_vm10, %v2459_v10 }
  0x75   :  { %2460 = vmatmul.msk.bf16.gmra.mxu0 %vm3929_vm10, %v2459_v10  ;;  %v3129_v10 = vld [vmem:[%s4831_s3 + $0x1d4] sm:$0xf]  ;;  %1402 = vmatpush.bf16.msrb.mxu2 %v2542_v31  ;;  %v2587_v31 = vld [vmem:[%s4831_s3 + $0x198] sm:$0xf0] }
  0x77   :  { %2478 = vmatmul.msk.bf16.gmra.mxu3 %vm3929_vm10, %v2465_v22 }
  0x78   :  { %2466 = vmatmul.msk.bf16.gmra.mxu1 %vm3929_vm10, %v2465_v22  ;;  %v2619_v22 = vld [vmem:[%s4831_s3 + $0x1d8] sm:$0xf0] }
  0x79   :  { %1403 = vmatpush.bf16.msrb.mxu2 %v2534_v57 }
  0x7d   :  { %1404 = vmatpush.bf16.msrb.mxu2 %v2526_v4 }
  0xa0   :  { %v441_v39 = vpop.f32.mrf.mxu0 }
  0xa1   :  { %v460_v45 = vpop.f32.mrf.mxu1 }
  0xa2   :  { %v3941_v11 = vadd.f32 %v460_v45, %v441_v39  ;;  %v2617_v39 = vld [vmem:[%s4831_s3 + $0x1d0] sm:$0xf]  ;;  %v2622_v45 = vor.u32 %v3129_v10, %v2619_v22  ;;  %v3124_v10 = vld [vmem:[%s4831_s3 + $0x1a4] sm:$0xf0] }
  0xa4   :  { %1419 = vmatpush.bf16.msrb.mxu3 %v2622_v45 }
  0xa7   :  { %v479_v13 = vpop.f32.mrf.mxu2 }
  0xa8   :  { %v498_v14 = vpop.f32.mrf.mxu3  ;;  %v3943_v15 = vpop.f32.mrf.mxu0 }
  0xa9   :  { %v3945_v16 = vadd.f32 %v498_v14, %v479_v13  ;;  %v3947_v18 = vpop.f32.mrf.mxu1  ;;  %v3130_v13 = vld [vmem:[%s4831_s3 + $0x1d4] sm:$0xf0] }
  0xaa   :  { %v2618_v14 = vor.u32 %v3130_v13, %v2617_v39  ;;  %v2594_v39 = vor.u32 %v3124_v10, %v2593_v17  ;;  %v2513_v13 = vld [vmem:[%s4831_s3 + $0x100] sm:$0xf]  ;;  %v2763_v17 = vld [vmem:[%s4831_s3 + $0xf8] sm:$0xf0]  ;;  %v2761_v10 = vld [vmem:[%s4831_s3 + $0xf0] sm:$0xf]  ;;  %v463_v5 = vadd.f32 %v3947_v18, %v3943_v15 }
  0xab   :  { %v2665_v15 = vld [vmem:[%s4831_s3 + $0x30] sm:$0xf]  ;;  %v3078_v18 = vld [vmem:[%s4831_s3 + $0x34] sm:$0xf0] }
  0xac   :  { %1381 = vmatpush.bf16.msrb.mxu1 %v2618_v14  ;;  %v3104_v14 = vld [vmem:[%s4831_s3 + $0x104] sm:$0xf0] }
  0xaf   :  { %v3949_v19 = vpop.f32.mrf.mxu2 }
  0xb0   :  { %v3951_v20 = vpop.f32.mrf.mxu3  ;;  %v446_v23 = vpop.f32.mrf.mxu0 }
  0xb1   :  { %v465_v24 = vpop.f32.mrf.mxu1 }
  0xb2   :  { %v3953_v25 = vadd.f32 %v465_v24, %v446_v23  ;;  %v2537_v23 = vld [vmem:[%s4831_s3 + $0x130] sm:$0xf]  ;;  %v3110_v24 = vld [vmem:[%s4831_s3 + $0x134] sm:$0xf0] }
  0xb3   :  { %v2538_v26 = vor.u32 %v3110_v24, %v2537_v23  ;;  %v3103_v23 = vld [vmem:[%s4831_s3 + $0x104] sm:$0xf]  ;;  %v2514_v24 = vor.u32 %v3104_v14, %v2513_v13  ;;  %v3102_v13 = vld [vmem:[%s4831_s3 + $0xf4] sm:$0xf0] }
  0xb4   :  { %v2762_v14 = vor.u32 %v3102_v13, %v2761_v10  ;;  %v3098_v10 = vld [vmem:[%s4831_s3 + $0xd4] sm:$0xf0] }
  0xb5   :  { %1364 = vmatpush.bf16.msrb.mxu0 %v2538_v26  ;;  %v2515_v26 = vld [vmem:[%s4831_s3 + $0x108] sm:$0xf0] }
  0xb6   :  { %v2518_v27 = vor.u32 %v3103_v23, %v2515_v26  ;;  %v2681_v23 = vld [vmem:[%s4831_s3 + $0x50] sm:$0xf]  ;;  %v3081_v26 = vld [vmem:[%s4831_s3 + $0x54] sm:$0xf] }
  0xb7   :  { %v484_v32 = vpop.f32.mrf.mxu2 }
  0xb8   :  { %v503_v34 = vpop.f32.mrf.mxu3  ;;  %v3967_v35 = vpop.f32.mrf.mxu0  ;;  %1405 = vmatpush.bf16.msrb.mxu2 %v2518_v27 }
  0xb9   :  { %v3969_v40 = vadd.f32 %v503_v34, %v484_v32  ;;  %v3971_v43 = vpop.f32.mrf.mxu1  ;;  %v3127_v32 = vld [vmem:[%s4831_s3 + $0x1c4] sm:$0xf]  ;;  %v2609_v34 = vld [vmem:[%s4831_s3 + $0x1c0] sm:$0xf]  ;;  %1365 = vmatpush.bf16.msrb.mxu0 %v2530_v55  ;;  %v2699_v55 = vld [vmem:[%s4831_s3 + $0x78] sm:$0xf0] }
  0xba   :  { %v2614_v47 = vor.u32 %v3127_v32, %v2611_v33  ;;  %v2610_v50 = vor.u32 %v3128_v48, %v2609_v34  ;;  %v2585_v32 = vld [vmem:[%s4831_s3 + $0x190] sm:$0xf]  ;;  %v2590_v33 = vor.u32 %v3121_v28, %v2587_v31  ;;  %v3122_v34 = vld [vmem:[%s4831_s3 + $0x194] sm:$0xf0]  ;;  %v2702_v57 = vor.u32 %v3085_v51, %v2699_v55  ;;  %v2683_v31 = vld [vmem:[%s4831_s3 + $0x58] sm:$0xf0] }
  0xbb   :  { %v2697_v48 = vld [vmem:[%s4831_s3 + $0x70] sm:$0xf] }
  0xbc   :  { %1420 = vmatpush.bf16.msrb.mxu3 %v2614_v47  ;;  %1382 = vmatpush.bf16.msrb.mxu1 %v2610_v50  ;;  %v2586_v47 = vor.u32 %v3122_v34, %v2585_v32  ;;  %v3086_v50 = vld [vmem:[%s4831_s3 + $0x74] sm:$0xf0]  ;;  %v3099_v34 = vld [vmem:[%s4831_s3 + $0xe4] sm:$0xf] }
  0xbd   :  { %1366 = vmatpush.bf16.msrb.mxu0 %v2522_v42  ;;  %v2698_v53 = vor.u32 %v3086_v50, %v2697_v48  ;;  %1634 = vmatpush.bf16.msra.mxu2 %v2702_v57  ;;  %v3084_v42 = vld [vmem:[%s4831_s3 + $0x64] sm:$0xf0]  ;;  %v2753_v48 = vld [vmem:[%s4831_s3 + $0xe0] sm:$0xf] }
  0xbe   :  { %v2690_v4 = vor.u32 %v3084_v42, %v2689_v1  ;;  %v3100_v57 = vld [vmem:[%s4831_s3 + $0xe4] sm:$0xf0]  ;;  %v3097_v42 = vld [vmem:[%s4831_s3 + $0xd4] sm:$0xf] }
  0xbf   :  { %v4009_v37 = vpop.f32.mrf.mxu2  ;;  %v2754_v59 = vor.u32 %v3100_v57, %v2753_v48  ;;  %v2657_v48 = vld [vmem:[%s4831_s3 + $0x20] sm:$0xf]  ;;  %v3076_v57 = vld [vmem:[%s4831_s3 + $0x24] sm:$0xf0] }
  0xc0   :  { %v4020_v41 = vpop.f32.mrf.mxu3  ;;  %1421 = vmatpush.bf16.msrb.mxu3 %v2606_v60  ;;  %1383 = vmatpush.bf16.msrb.mxu1 %v2602_v62  ;;  %v2577_v60 = vld [vmem:[%s4831_s3 + $0x180] sm:$0xf]  ;;  %v3120_v62 = vld [vmem:[%s4831_s3 + $0x184] sm:$0xf0] }
  0xc1   :  { %1367 = vmatpush.bf16.msrb.mxu0 %v2514_v24  ;;  %v2578_v0 = vor.u32 %v3120_v62, %v2577_v60  ;;  %1635 = vmatpush.bf16.msra.mxu2 %v2694_v6  ;;  %v3082_v24 = vld [vmem:[%s4831_s3 + $0x54] sm:$0xf0]  ;;  %v2673_v60 = vld [vmem:[%s4831_s3 + $0x40] sm:$0xf] }
  0xc2   :  { %v4025_v2 = vpop.f32.mrf.mxu0  ;;  %v2682_v28 = vor.u32 %v3082_v24, %v2681_v23 }
  0xc3   :  { %v678_v50 = vadd.f32 %v4025_v2, %v3941_v11  ;;  %v3080_v11 = vld [vmem:[%s4831_s3 + $0x44] sm:$0xf0]  ;;  %v3079_v2 = vld [vmem:[%s4831_s3 + $0x44] sm:$0xf] }
  0xc4   :  { %1422 = vmatpush.bf16.msrb.mxu3 %v2598_v9  ;;  %1384 = vmatpush.bf16.msrb.mxu1 %v2594_v39  ;;  %v3101_v9 = vld [vmem:[%s4831_s3 + $0xf4] sm:$0xf]  ;;  %v2674_v62 = vor.u32 %v3080_v11, %v2673_v60 }
  0xc5   :  { %v4036_v7 = vpop.f32.mrf.mxu1  ;;  %1596 = vmatpush.bf16.msra.mxu0 %v2698_v53  ;;  %v2766_v39 = vor.u32 %v3101_v9, %v2763_v17  ;;  %v4251_v53 = vld [vmem:[%s4832_s2] sm:$0x3]  ;;  %v2750_v17 = vor.u32 %v3097_v42, %v2747_v38 }
  0xc6   :  { %v697_v6 = vadd.f32 %v4036_v7, %v678_v50  ;;  %v4281_v9 = vperm.slane %v4251_v53, 0  ;;  %v3077_v7 = vld [vmem:[%s4831_s3 + $0x34] sm:$0xf] }
  0xc7   :  { %v4065_v29 = vpop.f32.mrf.mxu2 }
  0xc8   :  { %1423 = vmatpush.bf16.msrb.mxu3 %v2590_v33  ;;  %1385 = vmatpush.bf16.msrb.mxu1 %v2586_v47  ;;  %v2686_v33 = vor.u32 %v3081_v26, %v2683_v31  ;;  %v2755_v47 = vld [vmem:[%s4831_s3 + $0xe8] sm:$0xf0]  ;;  %v3095_v26 = vld [vmem:[%s4831_s3 + $0xc4] sm:$0xf] }
  0xc9   :  { %1597 = vmatpush.bf16.msra.mxu0 %v2690_v4  ;;  %v2758_v55 = vor.u32 %v3099_v34, %v2755_v47  ;;  %v2745_v4 = vld [vmem:[%s4831_s3 + $0xd0] sm:$0xf]  ;;  %v2737_v34 = vld [vmem:[%s4831_s3 + $0xc0] sm:$0xf]  ;;  %v3096_v47 = vld [vmem:[%s4831_s3 + $0xc4] sm:$0xf0] }
  0xca   :  { %v4076_v46 = vpop.f32.mrf.mxu3  ;;  %v4081_v49 = vpop.f32.mrf.mxu0  ;;  %1636 = vmatpush.bf16.msra.mxu2 %v2686_v33  ;;  %v2746_v13 = vor.u32 %v3098_v10, %v2745_v4  ;;  %v4341_v4 = vperm.slane %v4251_v53, 1  ;;  %v3074_v53 = vld [vmem:[%s4831_s3 + $0x14] sm:$0xf0] }
  0xcc   :  { %1424 = vmatpush.bf16.msrb.mxu3 %v2582_v36  ;;  %1386 = vmatpush.bf16.msrb.mxu1 %v2578_v0  ;;  %v2675_v0 = vld [vmem:[%s4831_s3 + $0x48] sm:$0xf0] }
  0xcd   :  { %v4092_v54 = vpop.f32.mrf.mxu1  ;;  %1598 = vmatpush.bf16.msra.mxu0 %v2682_v28  ;;  %v2678_v1 = vor.u32 %v3079_v2, %v2675_v0  ;;  %v2739_v28 = vld [vmem:[%s4831_s3 + $0xc8] sm:$0xf0]  ;;  %v2658_v2 = vor.u32 %v3076_v57, %v2657_v48  ;;  %v3072_v48 = vld [vmem:[%s4831_s3 + $0x4] sm:$0xf0] }
  0xcf   :  { %v4121_v3 = vpop.f32.mrf.mxu2  ;;  %1637 = vmatpush.bf16.msra.mxu2 %v2678_v1 }
  0xd0   :  { %1653 = vmatpush.bf16.msra.mxu3 %v2766_v39  ;;  %1615 = vmatpush.bf16.msra.mxu1 %v2762_v14  ;;  %v716_v39 = vadd.f32 %v4065_v29, %v3945_v16  ;;  %v680_v14 = vadd.f32 %v4081_v49, %v463_v5  ;;  %v2666_v16 = vor.u32 %v3078_v18, %v2665_v15  ;;  %v2667_v29 = vld [vmem:[%s4831_s3 + $0x38] sm:$0xf0] }
  0xd1   :  { %1599 = vmatpush.bf16.msra.mxu0 %v2674_v62  ;;  %v2670_v33 = vor.u32 %v3077_v7, %v2667_v29  ;;  %v2742_v49 = vor.u32 %v3095_v26, %v2739_v28  ;;  %v2723_v29 = vld [vmem:[%s4831_s3 + $0xa8] sm:$0xf0]  ;;  %v2721_v26 = vld [vmem:[%s4831_s3 + $0xa0] sm:$0xf]  ;;  %v3092_v28 = vld [vmem:[%s4831_s3 + $0xa4] sm:$0xf0] }
  0xd2   :  { %v4129_v8 = vpop.f32.mrf.mxu3  ;;  %v4137_v22 = vpop.f32.mrf.mxu0  ;;  %v735_v60 = vadd.f32 %v4076_v46, %v716_v39  ;;  %v699_v62 = vadd.f32 %v4092_v54, %v680_v14  ;;  %v2729_v46 = vld [vmem:[%s4831_s3 + $0xb0] sm:$0xf]  ;;  %v3091_v14 = vld [vmem:[%s4831_s3 + $0xa4] sm:$0xf]  ;;  %v2722_v57 = vor.u32 %v3092_v28, %v2721_v26 }
  0xd3   :  { %1638 = vmatpush.bf16.msra.mxu2 %v2670_v33  ;;  %v2649_v39 = vld [vmem:[%s4831_s3 + $0x10] sm:$0xf] }
  0xd4   :  { %1654 = vmatpush.bf16.msra.mxu3 %v2758_v55  ;;  %1616 = vmatpush.bf16.msra.mxu1 %v2754_v59  ;;  %v2738_v55 = vor.u32 %v3096_v47, %v2737_v34  ;;  %v501_v59 = vadd.f32 %v3951_v20, %v3949_v19  ;;  %v3093_v19 = vld [vmem:[%s4831_s3 + $0xb4] sm:$0xf]  ;;  %v2731_v20 = vld [vmem:[%s4831_s3 + $0xb8] sm:$0xf0]  ;;  %v2726_v34 = vor.u32 %v3091_v14, %v2723_v29  ;;  %v2641_v47 = vld [vmem:[%s4831_s3] sm:$0xf] }
  0xd5   :  { %v4139_v45 = vpop.f32.mrf.mxu1  ;;  %1600 = vmatpush.bf16.msra.mxu0 %v2666_v16  ;;  %v2707_v14 = vld [vmem:[%s4831_s3 + $0x88] sm:$0xf0] }
  0xd6   :  { %v718_v38 = vadd.f32 %v4121_v3, %v501_v59  ;;  %v3094_v3 = vld [vmem:[%s4831_s3 + $0xb4] sm:$0xf0]  ;;  %v3071_v59 = vld [vmem:[%s4831_s3 + $0x4] sm:$0xf] }
  0xd7   :  { %v4174_v52 = vpop.f32.mrf.mxu2  ;;  %v2730_v10 = vor.u32 %v3094_v3, %v2729_v46 }
  0xd8   :  { %1655 = vmatpush.bf16.msra.mxu3 %v2750_v17  ;;  %1617 = vmatpush.bf16.msra.mxu1 %v2746_v13  ;;  %v2734_v17 = vor.u32 %v3093_v19, %v2731_v20  ;;  %v3073_v13 = vld [vmem:[%s4831_s3 + $0x14] sm:$0xf] }
  0xd9   :  { %1601 = vmatpush.bf16.msra.mxu0 %v2658_v2 }
  0xda   :  { %v4179_v56 = vpop.f32.mrf.mxu3  ;;  %v4190_v61 = vpop.f32.mrf.mxu0 }
  0xdc   :  { %1656 = vmatpush.bf16.msra.mxu3 %v2742_v49  ;;  %1618 = vmatpush.bf16.msra.mxu1 %v2738_v55 }
  0xdd   :  { %v4195_v63 = vpop.f32.mrf.mxu1 }
  0xdf   :  { %v4230_v27 = vpop.f32.mrf.mxu2 }
  0xe0   :  { %1657 = vmatpush.bf16.msra.mxu3 %v2734_v17  ;;  %1619 = vmatpush.bf16.msra.mxu1 %v2730_v10  ;;  %v2881_v17 = vld [vmem:[%s4831_s3 + $0x270] sm:$0xf]  ;;  %v3150_v10 = vld [vmem:[%s4831_s3 + $0x274] sm:$0xf0] }
  0xe2   :  { %v4235_v32 = vpop.f32.mrf.mxu3  ;;  %v946_v51 = vpop.f32.mrf.mxu0 }
  0xe4   :  { %1658 = vmatpush.bf16.msra.mxu3 %v2726_v34  ;;  %1620 = vmatpush.bf16.msra.mxu1 %v2722_v57 }
  0xe5   :  { %v965_v58 = vpop.f32.mrf.mxu1 }
  0xe6   :  { %v966_v36 = vadd.f32 %v965_v58, %v946_v51  ;;  %v3075_v58 = vld [vmem:[%s4831_s3 + $0x24] sm:$0xf] }
  0xe7   :  { %v984_v24 = vpop.f32.mrf.mxu2 }
  0xe8   :  { %v1013_v23 = vadd.f32 %v966_v36, %v697_v6  ;;  %v2659_v36 = vld [vmem:[%s4831_s3 + $0x28] sm:$0xf0]  ;;  %v683_v6 = vadd.f32 %v4137_v22, %v3953_v25  ;;  %v2650_v25 = vor.u32 %v3074_v53, %v2649_v39  ;;  %v2651_v22 = vld [vmem:[%s4831_s3 + $0x18] sm:$0xf0] }
  0xe9   :  { %v2662_v42 = vor.u32 %v3075_v58, %v2659_v36  ;;  %v2654_v16 = vor.u32 %v3073_v13, %v2651_v22  ;;  %v2642_v58 = vor.u32 %v3072_v48, %v2641_v47  ;;  %v2715_v36 = vld [vmem:[%s4831_s3 + $0x98] sm:$0xf0] }
  0xea   :  { %v1003_v31 = vpop.f32.mrf.mxu3  ;;  %v948_v51 = vpop.f32.mrf.mxu0  ;;  %v1027_v0 = vadd.f32 %v4281_v9, %v1013_v23  ;;  %v737_v23 = vadd.f32 %v4129_v8, %v718_v38  ;;  %1602 = vmatpush.bf16.msra.mxu0 %v2650_v25  ;;  %v2883_v13 = vld [vmem:[%s4831_s3 + $0x278] sm:$0xf0] }
  0xeb   :  { %v1004_v50 = vadd.f32 %v1003_v31, %v984_v24  ;;  %1639 = vmatpush.bf16.msra.mxu2 %v2662_v42 }
  0xec   :  { %v1035_v15 = vmul.f32 0.01, %v1027_v0 }
  0xed   :  { %v967_v11 = vpop.f32.mrf.mxu1  ;;  %v1014_v54 = vadd.f32 %v1004_v50, %v735_v60  ;;  %v468_v50 = vadd.f32 %v3971_v43, %v3967_v35  ;;  %v2643_v60 = vld [vmem:[%s4831_s3 + $0x8] sm:$0xf0]  ;;  %v721_v35 = vadd.f32 %v4174_v52, %v3969_v40  ;;  %v3090_v40 = vld [vmem:[%s4831_s3 + $0x94] sm:$0xf0] }
  0xee   :  { %v968_v1 = vadd.f32 %v967_v11, %v948_v51  ;;  %v702_v51 = vadd.f32 %v4139_v45, %v683_v6  ;;  %v3089_v11 = vld [vmem:[%s4831_s3 + $0x94] sm:$0xf]  ;;  %v4395_v43 = vmax.f32 %v1027_v0, %v1035_v15  ;;  %v2646_v42 = vor.u32 %v3071_v59, %v2643_v60  ;;  %1603 = vmatpush.bf16.msra.mxu0 %v2642_v58  ;;  %v3087_v15 = vld [vmem:[%s4831_s3 + $0x84] sm:$0xf] }
  0xef   :  { %v986_v7 = vpop.f32.mrf.mxu2  ;;  %v1028_v31 = vadd.f32 %v4341_v4, %v1014_v54  ;;  %1640 = vmatpush.bf16.msra.mxu2 %v2654_v16  ;;  %v2718_v38 = vor.u32 %v3089_v11, %v2715_v36  ;;  %v685_v20 = vadd.f32 %v4190_v61, %v468_v50  ;;  %v740_v61 = vadd.f32 %v4179_v56, %v721_v35  ;;  %v2875_v50 = vld [vmem:[%s4831_s3 + $0x268] sm:$0xf0]  ;;  %v3165_v36 = vld [vmem:[%s4831_s3 + $0x2f4] sm:$0xf] }
  0xf0   :  { %v1015_v5 = vadd.f32 %v968_v1, %v699_v62  ;;  %v2713_v62 = vld [vmem:[%s4831_s3 + $0x90] sm:$0xf]  ;;  %v2710_v28 = vor.u32 %v3087_v15, %v2707_v14  ;;  %v1099_v34 = vrot.slane %v4395_v43, 1  ;;  %v3164_v15 = vld [vmem:[%s4831_s3 + $0x2e4] sm:$0xf0] }
  0xf1   :  { %v1036_v52 = vmul.f32 0.01, %v1028_v31  ;;  %v2714_v54 = vor.u32 %v3090_v40, %v2713_v62  ;;  %1659 = vmatpush.bf16.msra.mxu3 %v2718_v38  ;;  %v704_v16 = vadd.f32 %v4195_v63, %v685_v20  ;;  %v3147_v63 = vld [vmem:[%s4831_s3 + $0x264] sm:$0xf]  ;;  %v2947_v62 = vld [vmem:[%s4831_s3 + $0x2f8] sm:$0xf0] }
  0xf2   :  { %v1029_v18 = vadd.f32 %v4281_v9, %v1015_v5  ;;  %v1005_v24 = vpop.f32.mrf.mxu3  ;;  %v951_v49 = vpop.f32.mrf.mxu0  ;;  %v506_v5 = vadd.f32 %v4020_v41, %v4009_v37  ;;  %v2882_v37 = vor.u32 %v3150_v10, %v2881_v17  ;;  %v3149_v41 = vld [vmem:[%s4831_s3 + $0x274] sm:$0xf]  ;;  %v2878_v11 = vor.u32 %v3147_v63, %v2875_v50  ;;  %v3162_v63 = vld [vmem:[%s4831_s3 + $0x2d4] sm:$0xf0] }
  0xf3   :  { %v1006_v8 = vadd.f32 %v1005_v24, %v986_v7  ;;  %1641 = vmatpush.bf16.msra.mxu2 %v2646_v42  ;;  %1621 = vmatpush.bf16.msra.mxu1 %v2714_v54  ;;  %v2886_v22 = vor.u32 %v3149_v41, %v2883_v13  ;;  %v3088_v24 = vld [vmem:[%s4831_s3 + $0x84] sm:$0xf0]  ;;  %v2950_v40 = vor.u32 %v3165_v36, %v2947_v62  ;;  %v3146_v54 = vld [vmem:[%s4831_s3 + $0x254] sm:$0xf0]  ;;  %v2939_v41 = vld [vmem:[%s4831_s3 + $0x2e8] sm:$0xf0] }
  0xf4   :  { %v1037_v33 = vmul.f32 0.01, %v1029_v18  ;;  %v2937_v13 = vld [vmem:[%s4831_s3 + $0x2e0] sm:$0xf]  ;;  %v3159_v62 = vld [vmem:[%s4831_s3 + $0x2c4] sm:$0xf] }
  0xf5   :  { %v970_v55 = vpop.f32.mrf.mxu1  ;;  %v1016_v2 = vadd.f32 %v1006_v8, %v737_v23  ;;  %v2705_v23 = vld [vmem:[%s4831_s3 + $0x80] sm:$0xf]  ;;  %v3148_v8 = vld [vmem:[%s4831_s3 + $0x264] sm:$0xf0]  ;;  %1660 = vmatpush.bf16.msra.mxu3 %v2710_v28  ;;  %v3143_v28 = vld [vmem:[%s4831_s3 + $0x244] sm:$0xf] }
  0xf6   :  { %v4397_v45 = vmax.f32 %v1029_v18, %v1037_v33  ;;  %v971_v1 = vadd.f32 %v970_v55, %v951_v49  ;;  %v4431_v18 = vmax.f32 %v1028_v31, %v1036_v52  ;;  %v2706_v31 = vor.u32 %v3088_v24, %v2705_v23  ;;  %v2873_v33 = vld [vmem:[%s4831_s3 + $0x260] sm:$0xf]  ;;  %v2945_v52 = vld [vmem:[%s4831_s3 + $0x2f0] sm:$0xf] }
  0xf7   :  { %v1030_v0 = vadd.f32 %v4341_v4, %v1016_v2  ;;  %v989_v6 = vpop.f32.mrf.mxu2  ;;  %v723_v49 = vadd.f32 %v4230_v27, %v506_v5  ;;  %v2874_v27 = vor.u32 %v3148_v8, %v2873_v33  ;;  %v3145_v5 = vld [vmem:[%s4831_s3 + $0x254] sm:$0xf]  ;;  %v2857_v24 = vld [vmem:[%s4831_s3 + $0x240] sm:$0xf] }
  0xf8   :  { %v1095_v19 = vpack.c.bf16 %v4397_v45, %v4395_v43  ;;  %v1017_v46 = vadd.f32 %v971_v1, %v702_v51  ;;  %v1100_v51 = vrot.slane %v4397_v45, 1  ;;  %1622 = vmatpush.bf16.msra.mxu1 %v2706_v31  ;;  %v1102_v58 = vrot.slane %v4431_v18, 1  ;;  %v2859_v31 = vld [vmem:[%s4831_s3 + $0x248] sm:$0xf0]  ;;  %v3161_v33 = vld [vmem:[%s4831_s3 + $0x2d4] sm:$0xf] }
  0xf9   :  { %v1038_v3 = vmul.f32 0.01, %v1030_v0 }
  0xfa   :  { %1368 = vmatmul.bf16.vlgmr.msrb.gmra.mxu0 %v1095_v19  ;;  %1406 = vmatmul.bf16.vlgmr.msrb.gmra.mxu2 %v1095_v19  ;;  %v1031_v39 = vadd.f32 %v4281_v9, %v1017_v46  ;;  %v1008_v53 = vpop.f32.mrf.mxu3  ;;  %v953_v25 = vpop.f32.mrf.mxu0  ;;  %v742_v19 = vadd.f32 %v4235_v32, %v723_v49 }
  0xfb   :  { %v4433_v56 = vmax.f32 %v1030_v0, %v1038_v3  ;;  %v1009_v7 = vadd.f32 %v1008_v53, %v989_v6  ;;  %1865 = vmatpush.bf16.msrb.mxu0 %v2882_v37  ;;  %1903 = vmatpush.bf16.msrb.mxu2 %v2886_v22  ;;  %v3166_v0 = vld [vmem:[%s4831_s3 + $0x2f4] sm:$0xf0]  ;;  %v1101_v3 = vsel %vm162_vm6, %v1099_v34, %v1100_v51  ;;  %v3163_v53 = vld [vmem:[%s4831_s3 + $0x2e4] sm:$0xf] }
  0xfc   :  { %v1039_v29 = vmul.f32 0.01, %v1031_v39  ;;  %v2946_v46 = vor.u32 %v3166_v0, %v2945_v52  ;;  %v2942_v23 = vor.u32 %v3163_v53, %v2939_v41  ;;  %v2862_v34 = vor.u32 %v3143_v28, %v2859_v31  ;;  %v3160_v52 = vld [vmem:[%s4831_s3 + $0x2c4] sm:$0xf0]  ;;  %v2913_v53 = vld [vmem:[%s4831_s3 + $0x2b0] sm:$0xf] }
  0xfd   :  { %v972_v26 = vpop.f32.mrf.mxu1  ;;  %v1018_v47 = vadd.f32 %v1009_v7, %v740_v61  ;;  %v1096_v55 = vpack.c.bf16 %v4433_v56, %v4431_v18  ;;  %v1103_v35 = vrot.slane %v4433_v56, 1  ;;  %v2833_v41 = vld [vmem:[%s4831_s3 + $0x210] sm:$0xf]  ;;  %v2905_v28 = vld [vmem:[%s4831_s3 + $0x2a0] sm:$0xf] }
  0xfe   :  { %v973_v48 = vadd.f32 %v972_v26, %v953_v25  ;;  %v4462_v57 = vmax.f32 %v1031_v39, %v1039_v29  ;;  %v2867_v39 = vld [vmem:[%s4831_s3 + $0x258] sm:$0xf0]  ;;  %v2938_v29 = vor.u32 %v3164_v15, %v2937_v13  ;;  %v3138_v13 = vld [vmem:[%s4831_s3 + $0x214] sm:$0xf0]  ;;  %v3156_v31 = vld [vmem:[%s4831_s3 + $0x2a4] sm:$0xf0] }
  0xff   :  { %v1032_v59 = vadd.f32 %v4341_v4, %v1018_v47  ;;  %1387 = vmatmul.bf16.vlgmr.msrb.gmra.mxu1 %v1096_v55  ;;  %1425 = vmatmul.bf16.vlgmr.msrb.gmra.mxu3 %v1096_v55  ;;  %v991_v38 = vpop.f32.mrf.mxu2  ;;  %v2870_v37 = vor.u32 %v3145_v5, %v2867_v39  ;;  %v2931_v47 = vld [vmem:[%s4831_s3 + $0x2d8] sm:$0xf0]  ;;  %v1104_v55 = vsel %vm162_vm6, %v1102_v58, %v1103_v35  ;;  %v3141_v58 = vld [vmem:[%s4831_s3 + $0x234] sm:$0xf]  ;;  %v2843_v5 = vld [vmem:[%s4831_s3 + $0x228] sm:$0xf0] }
 0x100   :  { %v1019_v60 = vadd.f32 %v973_v48, %v704_v16  ;;  %v1105_v2 = vrot.slane %v4462_v57, 1  ;;  %1866 = vmatpush.bf16.msrb.mxu0 %v2874_v27  ;;  %1904 = vmatpush.bf16.msrb.mxu2 %v2878_v11  ;;  %v3144_v16 = vld [vmem:[%s4831_s3 + $0x244] sm:$0xf0]  ;;  %v2929_v48 = vld [vmem:[%s4831_s3 + $0x2d0] sm:$0xf]  ;;  %v2934_v50 = vor.u32 %v3161_v33, %v2931_v47 }
 0x101   :  { %v1040_v1 = vmul.f32 0.01, %v1032_v59  ;;  %1922 = vmatpush.bf16.msrb.mxu3 %v2950_v40  ;;  %1884 = vmatpush.bf16.msrb.mxu1 %v2946_v46  ;;  %v2858_v26 = vor.u32 %v3144_v16, %v2857_v24  ;;  %v2921_v40 = vld [vmem:[%s4831_s3 + $0x2c0] sm:$0xf]  ;;  %v3139_v46 = vld [vmem:[%s4831_s3 + $0x224] sm:$0xf] }
 0x102   :  { %v1033_v42 = vadd.f32 %v4281_v9, %v1019_v60  ;;  %v1010_v20 = vpop.f32.mrf.mxu3  ;;  %v2865_v9 = vld [vmem:[%s4831_s3 + $0x250] sm:$0xf]  ;;  %v1106_v32 = vsel %vm162_vm6, %v1100_v51, %v1105_v2  ;;  %v2930_v51 = vor.u32 %v3162_v63, %v2929_v48  ;;  %v3142_v60 = vld [vmem:[%s4831_s3 + $0x234] sm:$0xf0]  ;;  %v2915_v39 = vld [vmem:[%s4831_s3 + $0x2b8] sm:$0xf0] }
 0x103   :  { %v1011_v17 = vadd.f32 %v1010_v20, %v991_v38  ;;  %v4495_v10 = vmax.f32 %v1032_v59, %v1040_v1  ;;  %v2866_v61 = vor.u32 %v3146_v54, %v2865_v9  ;;  %v4512_v7 = vpack.c.bf16 %v1106_v32, %v1101_v3  ;;  %v2849_v59 = vld [vmem:[%s4831_s3 + $0x230] sm:$0xf]  ;;  %v2923_v38 = vld [vmem:[%s4831_s3 + $0x2c8] sm:$0xf0]  ;;  %v3140_v20 = vld [vmem:[%s4831_s3 + $0x224] sm:$0xf0] }
 0x104   :  { %v1041_v6 = vmul.f32 0.01, %v1033_v42  ;;  %1905 = vmatpush.bf16.msrb.mxu2 %v2870_v37  ;;  %v2850_v36 = vor.u32 %v3142_v60, %v2849_v59  ;;  %v2926_v0 = vor.u32 %v3159_v62, %v2923_v38  ;;  %v2922_v54 = vor.u32 %v3160_v52, %v2921_v40  ;;  %v2835_v24 = vld [vmem:[%s4831_s3 + $0x218] sm:$0xf0]  ;;  %v3155_v16 = vld [vmem:[%s4831_s3 + $0x2a4] sm:$0xf] }
 0x105   :  { %v1020_v25 = vadd.f32 %v1011_v17, %v742_v19  ;;  %v1107_v14 = vrot.slane %v4495_v10, 1  ;;  %1867 = vmatpush.bf16.msrb.mxu0 %v2866_v61  ;;  %1923 = vmatpush.bf16.msrb.mxu3 %v2942_v23  ;;  %v2841_v19 = vld [vmem:[%s4831_s3 + $0x220] sm:$0xf]  ;;  %v2846_v32 = vor.u32 %v3139_v46, %v2843_v5  ;;  %v1061_v17 = vrot.slane %v4397_v45, 7  ;;  %v3157_v61 = vld [vmem:[%s4831_s3 + $0x2b4] sm:$0xf] }
 0x106   :  { %v4514_v22 = vmax.f32 %v1033_v42, %v1041_v6  ;;  %1885 = vmatpush.bf16.msrb.mxu1 %v2938_v29  ;;  %v2842_v3 = vor.u32 %v3140_v20, %v2841_v19  ;;  %v1059_v6 = vrot.slane %v4395_v43, 7  ;;  %v2918_v37 = vor.u32 %v3157_v61, %v2915_v39  ;;  %v3158_v43 = vld [vmem:[%s4831_s3 + $0x2b4] sm:$0xf0]  ;;  %v3137_v23 = vld [vmem:[%s4831_s3 + $0x214] sm:$0xf] }
 0x107   :  { %v1034_v8 = vadd.f32 %v4341_v4, %v1020_v25  ;;  %v1108_v4 = vsel %vm162_vm6, %v1103_v35, %v1107_v14  ;;  %v2851_v35 = vld [vmem:[%s4831_s3 + $0x238] sm:$0xf0]  ;;  %v2914_v15 = vor.u32 %v3158_v43, %v2913_v53  ;;  %v2834_v25 = vor.u32 %v3138_v13, %v2833_v41  ;;  %v3135_v47 = vld [vmem:[%s4831_s3 + $0x204] sm:$0xf]  ;;  %v2827_v48 = vld [vmem:[%s4831_s3 + $0x208] sm:$0xf0] }
 0x108   :  { %v1097_v49 = vpack.c.bf16 %v4514_v22, %v4462_v57  ;;  %v4556_v11 = vpack.c.bf16 %v1108_v4, %v1104_v55  ;;  %1906 = vmatpush.bf16.msrb.mxu2 %v2862_v34  ;;  %v2854_v42 = vor.u32 %v3141_v58, %v2851_v35  ;;  %v2838_v29 = vor.u32 %v3137_v23, %v2835_v24  ;;  %v3136_v34 = vld [vmem:[%s4831_s3 + $0x204] sm:$0xf0]  ;;  %v3153_v63 = vld [vmem:[%s4831_s3 + $0x294] sm:$0xf]  ;;  %v2899_v4 = vld [vmem:[%s4831_s3 + $0x298] sm:$0xf0] }
 0x109   :  { %v1042_v27 = vmul.f32 0.01, %v1034_v8  ;;  %1868 = vmatpush.bf16.msrb.mxu0 %v2858_v26  ;;  %1924 = vmatpush.bf16.msrb.mxu3 %v2934_v50  ;;  %v2907_v26 = vld [vmem:[%s4831_s3 + $0x2a8] sm:$0xf0]  ;;  %v1062_v33 = vsel %vm113_vm0, %v1059_v6, %v1061_v17  ;;  %v1081_v50 = vsel %vm113_vm0, 0.0, %v1059_v6  ;;  %v2830_v60 = vor.u32 %v3135_v47, %v2827_v48 }
 0x10a   :  { %1373 = vmatmul.bf16.gmra.mxu0 %v1097_v49  ;;  %1411 = vmatmul.bf16.gmra.mxu2 %v1097_v49  ;;  %v2825_v49 = vld [vmem:[%s4831_s3 + $0x200] sm:$0xf]  ;;  %v2768_v59 = vpack.c.bf16 %v1062_v33, %v1081_v50  ;;  %v2897_v58 = vld [vmem:[%s4831_s3 + $0x290] sm:$0xf]  ;;  %v3154_v35 = vld [vmem:[%s4831_s3 + $0x294] sm:$0xf0] }
 0x10b   :  { %v4567_v1 = vmax.f32 %v1034_v8, %v1042_v27  ;;  %1886 = vmatpush.bf16.msrb.mxu1 %v2930_v51  ;;  %v2910_v8 = vor.u32 %v3155_v16, %v2907_v26  ;;  %v2906_v51 = vor.u32 %v3156_v31, %v2905_v28  ;;  %v2826_v55 = vor.u32 %v3136_v34, %v2825_v49  ;;  %v2889_v52 = vld [vmem:[%s4831_s3 + $0x280] sm:$0xf] }
 0x10c   :  { %1907 = vmatpush.bf16.msrb.mxu2 %v2854_v42  ;;  %v1063_v27 = vrot.slane %v4433_v56, 7  ;;  %v1060_v62 = vrot.slane %v4431_v18, 7  ;;  %v3151_v56 = vld [vmem:[%s4831_s3 + $0x284] sm:$0xf]  ;;  %v2891_v42 = vld [vmem:[%s4831_s3 + $0x288] sm:$0xf0]  ;;  %v2898_v38 = vor.u32 %v3154_v35, %v2897_v58 }
 0x10d   :  { %v1098_v9 = vpack.c.bf16 %v4567_v1, %v4495_v10  ;;  %1869 = vmatpush.bf16.msrb.mxu0 %v2850_v36  ;;  %1925 = vmatpush.bf16.msrb.mxu3 %v2926_v0  ;;  %v2902_v36 = vor.u32 %v3153_v63, %v2899_v4  ;;  %v2894_v18 = vor.u32 %v3151_v56, %v2891_v42  ;;  %v3152_v0 = vld [vmem:[%s4831_s3 + $0x284] sm:$0xf0]  ;;  %v1071_v6 = vrot.slane %v4567_v1, 7  ;;  %v1949_v35 = vld [vmem:[%s4833_s4] sm:$0x3] }
 0x10e   :  { %v1064_v40 = vsel %vm113_vm0, %v1060_v62, %v1063_v27  ;;  %v1082_v19 = vsel %vm113_vm0, 0.0, %v1060_v62  ;;  %v2890_v46 = vor.u32 %v3152_v0, %v2889_v52  ;;  %v1067_v12 = vrot.slane %v4495_v10, 7 }
 0x10f   :  { %1392 = vmatmul.bf16.gmra.mxu1 %v1098_v9  ;;  %1430 = vmatmul.bf16.gmra.mxu3 %v1098_v9  ;;  %v2774_v20 = vpack.c.bf16 %v1064_v40, %v1082_v19  ;;  %v1069_v9 = vrot.slane %v4514_v22, 7  ;;  %v1109_v45 = vrot.slane %v4514_v22, 1  ;;  %v1111_v43 = vrot.slane %v4567_v1, 1 }
 0x110   :  { %1887 = vmatpush.bf16.msrb.mxu1 %v2922_v54  ;;  %1908 = vmatpush.bf16.msrb.mxu2 %v2846_v32  ;;  %v1065_v54 = vrot.slane %v4462_v57, 7  ;;  %v1072_v61 = vsel %vm113_vm0, %v1067_v12, %v1071_v6  ;;  %v1068_v39 = vsel %vm113_vm0, %v1063_v27, %v1067_v12 }
 0x111   :  { %1870 = vmatpush.bf16.msrb.mxu0 %v2842_v3  ;;  %1926 = vmatpush.bf16.msrb.mxu3 %v2918_v37  ;;  %v2777_v53 = vpack.c.bf16 %v1072_v61, %v1068_v39  ;;  %v1110_v21 = vsel %vm162_vm6, %v1105_v2, %v1109_v45  ;;  %v1112_v44 = vsel %vm162_vm6, %v1107_v14, %v1111_v43  ;;  %v4763_v61 = vperm.slane %v1949_v35, 1 }
 0x112   :  { %v1070_v5 = vsel %vm113_vm0, %v1065_v54, %v1069_v9  ;;  %v1066_v3 = vsel %vm113_vm0, %v1061_v17, %v1065_v54  ;;  %v1121_v17 = vsel %vm162_vm6, %v1109_v45, 0.0 }
 0x113   :  { %v2771_v32 = vpack.c.bf16 %v1070_v5, %v1066_v3  ;;  %v2955_v37 = vpack.c.bf16 %v1121_v17, %v1110_v21 }
 0x114   :  { %1888 = vmatpush.bf16.msrb.mxu1 %v2914_v15  ;;  %1909 = vmatpush.bf16.msrb.mxu2 %v2838_v29 }
 0x115   :  { %1871 = vmatpush.bf16.msrb.mxu0 %v2834_v25  ;;  %1927 = vmatpush.bf16.msrb.mxu3 %v2910_v8 }
 0x118   :  { %1889 = vmatpush.bf16.msrb.mxu1 %v2906_v51  ;;  %1910 = vmatpush.bf16.msrb.mxu2 %v2830_v60 }
 0x119   :  { %1872 = vmatpush.bf16.msrb.mxu0 %v2826_v55  ;;  %1928 = vmatpush.bf16.msrb.mxu3 %v2902_v36 }
 0x11a   :  { %2769 = vmatmul.msk.bf16.vlgmr.msra.gmra.mxu0 %vm3715_vm3, %v2768_v59  ;;  %2781 = vmatmul.msk.bf16.vlgmr.msra.gmra.mxu2 %vm3715_vm3, %v2768_v59 }
 0x11c   :  { %1890 = vmatpush.bf16.msrb.mxu1 %v2898_v38 }
 0x11d   :  { %1929 = vmatpush.bf16.msrb.mxu3 %v2894_v18  ;;  %v4757_v18 = vperm.slane %v1949_v35, 0 }
 0x11f   :  { %2775 = vmatmul.msk.bf16.vlgmr.msra.gmra.mxu1 %vm3715_vm3, %v2774_v20  ;;  %2787 = vmatmul.msk.bf16.vlgmr.msra.gmra.mxu3 %vm3715_vm3, %v2774_v20 }
 0x120   :  { %1891 = vmatpush.bf16.msrb.mxu1 %v2890_v46 }
 0x12a   :  { %2772 = vmatmul.msk.bf16.gmra.mxu0 %vm3843_vm5, %v2771_v32  ;;  %2784 = vmatmul.msk.bf16.gmra.mxu2 %vm3843_vm5, %v2771_v32  ;;  %v3168_v32 = vld [vmem:[%s4830_s0] sm:$0xff] }
 0x12f   :  { %2778 = vmatmul.msk.bf16.gmra.mxu1 %vm3843_vm5, %v2777_v53  ;;  %2790 = vmatmul.msk.bf16.gmra.mxu3 %vm3843_vm5, %v2777_v53 }
 0x13a   :  { %2953 = vmatmul.msk.bf16.vlgmr.msrb.gmra.mxu0 %vm3909_vm8, %v4512_v7  ;;  %2965 = vmatmul.msk.bf16.vlgmr.msrb.gmra.mxu2 %vm3909_vm8, %v4512_v7  ;;  %v1122_v7 = vsel %vm162_vm6, %v1111_v43, 0.0 }
 0x13b   :  { %v2961_v57 = vpack.c.bf16 %v1122_v7, %v1112_v44 }
 0x13f   :  { %2959 = vmatmul.msk.bf16.vlgmr.msrb.gmra.mxu1 %vm3909_vm8, %v4556_v11  ;;  %2971 = vmatmul.msk.bf16.vlgmr.msrb.gmra.mxu3 %vm3909_vm8, %v4556_v11 }
 0x14a   :  { %2956 = vmatmul.msk.bf16.gmra.mxu0 %vm3929_vm10, %v2955_v37  ;;  %2968 = vmatmul.msk.bf16.gmra.mxu2 %vm3929_vm10, %v2955_v37 }
 0x14f   :  { %2962 = vmatmul.msk.bf16.gmra.mxu1 %vm3929_vm10, %v2961_v57  ;;  %2974 = vmatmul.msk.bf16.gmra.mxu3 %vm3929_vm10, %v2961_v57 }
 0x177   :  { %v1369_v2 = vpop.f32.mrf.mxu0 }
 0x17c   :  { %v1388_v11 = vpop.f32.mrf.mxu1 }
 0x17d   :  { %v1407_v22 = vpop.f32.mrf.mxu2  ;;  %v1389_v36 = vadd.f32 %v1388_v11, %v1369_v2  ;;  %v3169_v2 = vld [vmem:[%s4830_s0 + $0x8] sm:$0xff] }
 0x17f   :  { %v1371_v1 = vpop.f32.mrf.mxu0 }
 0x182   :  { %v1426_v41 = vpop.f32.mrf.mxu3 }
 0x183   :  { %v1427_v52 = vadd.f32 %v1426_v41, %v1407_v22 }
 0x184   :  { %v1390_v15 = vpop.f32.mrf.mxu1 }
 0x185   :  { %v1409_v13 = vpop.f32.mrf.mxu2  ;;  %v1391_v19 = vadd.f32 %v1390_v15, %v1371_v1 }
 0x187   :  { %v1374_v25 = vpop.f32.mrf.mxu0 }
 0x18a   :  { %v1428_v10 = vpop.f32.mrf.mxu3 }
 0x18b   :  { %v1429_v37 = vadd.f32 %v1428_v10, %v1409_v13  ;;  %v3170_v13 = vld [vmem:[%s4830_s0 + $0x10] sm:$0xff] }
 0x18c   :  { %v1393_v14 = vpop.f32.mrf.mxu1 }
 0x18d   :  { %v4730_v23 = vpop.f32.mrf.mxu2  ;;  %v1394_v7 = vadd.f32 %v1393_v14, %v1374_v25 }
 0x18f   :  { %v4732_v24 = vpop.f32.mrf.mxu0 }
 0x192   :  { %v4734_v16 = vpop.f32.mrf.mxu3 }
 0x194   :  { %v4738_v30 = vpop.f32.mrf.mxu1 }
 0x195   :  { %v4736_v29 = vpop.f32.mrf.mxu2 }
 0x197   :  { %v1605_v26 = vpop.f32.mrf.mxu0 }
 0x198   :  { %v1606_v62 = vadd.f32 %v1605_v26, %v1389_v36 }
 0x19a   :  { %v4740_v28 = vpop.f32.mrf.mxu3 }
 0x19c   :  { %v1624_v33 = vpop.f32.mrf.mxu1 }
 0x19d   :  { %v1643_v31 = vpop.f32.mrf.mxu2  ;;  %v1625_v38 = vadd.f32 %v1624_v33, %v1606_v62 }
 0x19e   :  { %v1644_v46 = vadd.f32 %v1643_v31, %v1427_v52 }
 0x19f   :  { %v1607_v8 = vpop.f32.mrf.mxu0 }
 0x1a0   :  { %v1608_v54 = vadd.f32 %v1607_v8, %v1391_v19 }
 0x1a2   :  { %v1662_v49 = vpop.f32.mrf.mxu3 }
 0x1a3   :  { %v1663_v3 = vadd.f32 %v1662_v49, %v1644_v46  ;;  %v1432_v49 = vadd.f32 %v4734_v16, %v4730_v23 }
 0x1a4   :  { %v1626_v47 = vpop.f32.mrf.mxu1 }
 0x1a5   :  { %v1645_v34 = vpop.f32.mrf.mxu2  ;;  %v1627_v53 = vadd.f32 %v1626_v47, %v1608_v54 }
 0x1a6   :  { %v1646_v57 = vadd.f32 %v1645_v34, %v1429_v37 }
 0x1a7   :  { %v1610_v48 = vpop.f32.mrf.mxu0 }
 0x1a8   :  { %v1611_v15 = vadd.f32 %v1610_v48, %v1394_v7 }
 0x1aa   :  { %v1664_v63 = vpop.f32.mrf.mxu3 }
 0x1ab   :  { %v1665_v26 = vadd.f32 %v1664_v63, %v1646_v57  ;;  %v1396_v63 = vadd.f32 %v4738_v30, %v4732_v24  ;;  %v3172_v24 = vld [vmem:[%s4830_s0 + $0x20] sm:$0xff] }
 0x1ac   :  { %v1629_v50 = vpop.f32.mrf.mxu1 }
 0x1ad   :  { %v4742_v4 = vpop.f32.mrf.mxu2  ;;  %v1630_v31 = vadd.f32 %v1629_v50, %v1611_v15  ;;  %v3171_v50 = vld [vmem:[%s4830_s0 + $0x18] sm:$0xff] }
 0x1af   :  { %v4744_v51 = vpop.f32.mrf.mxu0 }
 0x1b2   :  { %v4746_v55 = vpop.f32.mrf.mxu3 }
 0x1b4   :  { %v4750_v59 = vpop.f32.mrf.mxu1 }
 0x1b5   :  { %v4748_v27 = vpop.f32.mrf.mxu2 }
 0x1b7   :  { %v1874_v60 = vpop.f32.mrf.mxu0 }
 0x1ba   :  { %v4752_v58 = vpop.f32.mrf.mxu3 }
 0x1bc   :  { %v1893_v56 = vpop.f32.mrf.mxu1 }
 0x1bd   :  { %v1912_v42 = vpop.f32.mrf.mxu2  ;;  %v1894_v40 = vadd.f32 %v1893_v56, %v1874_v60  ;;  %v1649_v60 = vadd.f32 %v4742_v4, %v1432_v49  ;;  %v1613_v56 = vadd.f32 %v4744_v51, %v1396_v63 }
 0x1bf   :  { %v1941_v0 = vadd.f32 %v1894_v40, %v1625_v38  ;;  %v1876_v20 = vpop.f32.mrf.mxu0  ;;  %v1668_v23 = vadd.f32 %v4746_v55, %v1649_v60  ;;  %v1632_v38 = vadd.f32 %v4750_v59, %v1613_v56  ;;  %v1434_v40 = vadd.f32 %v4740_v28, %v4736_v29  ;;  %v3174_v29 = vld [vmem:[%s4830_s0 + $0x30] sm:$0xff] }
 0x1c1   :  { %v1955_v9 = vadd.f32 %v4757_v18, %v1941_v0  ;;  %v1651_v19 = vadd.f32 %v4748_v27, %v1434_v40 }
 0x1c2   :  { %v1931_v5 = vpop.f32.mrf.mxu3 }
 0x1c3   :  { %v1963_v6 = vadd.f32 %v3168_v32, %v1955_v9  ;;  %v1932_v12 = vadd.f32 %v1931_v5, %v1912_v42  ;;  %v1670_v5 = vadd.f32 %v4752_v58, %v1651_v19  ;;  %v3175_v58 = vld [vmem:[%s4830_s0 + $0x38] sm:$0xff] }
 0x1c4   :  { %v1895_v39 = vpop.f32.mrf.mxu1 }
 0x1c5   :  { %1971 = vst [vmem:[%s4834_s5] sm:$0xff] %v1963_v6  ;;  %v1942_v45 = vadd.f32 %v1932_v12, %v1663_v3  ;;  %v1896_v21 = vadd.f32 %v1895_v39, %v1876_v20  ;;  %v1914_v17 = vpop.f32.mrf.mxu2  ;;  %v3173_v20 = vld [vmem:[%s4830_s0 + $0x28] sm:$0xff] }
 0x1c7   :  { %v1956_v43 = vadd.f32 %v4763_v61, %v1942_v45  ;;  %v1943_v44 = vadd.f32 %v1896_v21, %v1627_v53  ;;  %v1879_v1 = vpop.f32.mrf.mxu0 }
 0x1c9   :  { %v1964_v22 = vadd.f32 %v3169_v2, %v1956_v43  ;;  %v1957_v11 = vadd.f32 %v4757_v18, %v1943_v44 }
 0x1ca   :  { %v1933_v41 = vpop.f32.mrf.mxu3 }
 0x1cb   :  { %1972 = vst [vmem:[%s4834_s5 + $0x8] sm:$0xff] %v1964_v22  ;;  %v1965_v25 = vadd.f32 %v3170_v13, %v1957_v11  ;;  %v1934_v10 = vadd.f32 %v1933_v41, %v1914_v17 }
 0x1cc   :  { %v1898_v14 = vpop.f32.mrf.mxu1 }
 0x1cd   :  { %1973 = vst [vmem:[%s4834_s5 + $0x10] sm:$0xff] %v1965_v25  ;;  %v1944_v33 = vadd.f32 %v1934_v10, %v1665_v26  ;;  %v1899_v8 = vadd.f32 %v1898_v14, %v1879_v1  ;;  %v1917_v48 = vpop.f32.mrf.mxu2 }
 0x1cf   :  { %v1958_v34 = vadd.f32 %v4763_v61, %v1944_v33  ;;  %v1945_v47 = vadd.f32 %v1899_v8, %v1630_v31  ;;  %v1881_v4 = vpop.f32.mrf.mxu0 }
 0x1d1   :  { %v1966_v36 = vadd.f32 %v3171_v50, %v1958_v34  ;;  %v1959_v35 = vadd.f32 %v4757_v18, %v1945_v47 }
 0x1d2   :  { %v1936_v62 = vpop.f32.mrf.mxu3 }
 0x1d3   :  { %1974 = vst [vmem:[%s4834_s5 + $0x18] sm:$0xff] %v1966_v36  ;;  %v1967_v16 = vadd.f32 %v3172_v24, %v1959_v35  ;;  %v1937_v30 = vadd.f32 %v1936_v62, %v1917_v48 }
 0x1d4   :  { %v1900_v42 = vpop.f32.mrf.mxu1 }
 0x1d5   :  { %1975 = vst [vmem:[%s4834_s5 + $0x20] sm:$0xff] %v1967_v16  ;;  %v1946_v51 = vadd.f32 %v1937_v30, %v1668_v23  ;;  %v1901_v55 = vadd.f32 %v1900_v42, %v1881_v4  ;;  %v1919_v9 = vpop.f32.mrf.mxu2 }
 0x1d7   :  { %v1960_v52 = vadd.f32 %v4763_v61, %v1946_v51  ;;  %v1947_v0 = vadd.f32 %v1901_v55, %v1632_v38 }
 0x1d9   :  { %v1968_v46 = vadd.f32 %v3173_v20, %v1960_v52  ;;  %v1961_v59 = vadd.f32 %v4757_v18, %v1947_v0 }
 0x1da   :  { %v1938_v54 = vpop.f32.mrf.mxu3 }
 0x1db   :  { %1976 = vst [vmem:[%s4834_s5 + $0x28] sm:$0xff] %v1968_v46  ;;  %v1969_v28 = vadd.f32 %v3174_v29, %v1961_v59  ;;  %v1939_v27 = vadd.f32 %v1938_v54, %v1919_v9 }
 0x1dd   :  { %1977 = vst [vmem:[%s4834_s5 + $0x30] sm:$0xff] %v1969_v28  ;;  %v1948_v3 = vadd.f32 %v1939_v27, %v1670_v5 }
 0x1df   :  { %v1962_v18 = vadd.f32 %v4763_v61, %v1948_v3 }
 0x1e1   :  { %v1970_v32 = vadd.f32 %v3175_v58, %v1962_v18 }
 0x1e3   :  { %1978 = vst [vmem:[%s4834_s5 + $0x38] sm:$0xff] %v1970_v32 }

</bundles_post_ra>
